<compile_context>
chip_gen: v6e
topology: v6e:2x2x1
jax: 0.10.0
libtpu: 0.0.40
codegen_flags: <defaults>
</compile_context>

<pallas_src>
import functools
import math

import jax
import jax.numpy as jnp
from jax.experimental import pallas as pl
from jax.experimental.pallas import tpu as pltpu


# ------------------------------------------------------------------
# Fused q/k/v SepConv2d kernel
#   depthwise KxK ('same', in-kernel zero pad) + bias + ReLU
#   -> pointwise 1x1 (MXU matmul, model-dtype inputs, f32 accumulation) + bias
#   -> per-head stores into a (BB, heads, N, dim_head) output block
# ------------------------------------------------------------------
def _fused_qkv_kernel(*refs, F, W, C, K, heads, dim_head, shared):
    if shared:
        (x_ref, dww_ref, dwb_ref, pww_ref, pwb_ref,
         q_ref, k_ref, v_ref, xpad_ref) = refs
        xkv_ref = x_ref
    else:
        (x_ref, xkv_ref, dww_ref, dwb_ref, pww_ref, pwb_ref,
         q_ref, k_ref, v_ref, xpad_ref) = refs

    BB = q_ref.shape[0]
    N = F * W
    M = BB * N
    pad = (K - 1) // 2
    mm_dtype = pww_ref.dtype                      # model dtype fed to the MXU

    dww = dww_ref[...]                            # (3, K*K, 1, C)  f32
    dwb = dwb_ref[...]                            # (3, 1, C)       f32
    pww = pww_ref[...]                            # (3, C, inner)   model dtype
    pwb = pwb_ref[...]                            # (3, 1, inner)   f32

    def load_pad(a_ref):
        # In-kernel 'same' zero padding + single f32 cast of the activation.
        xpad_ref[...] = jnp.zeros_like(xpad_ref)
        xpad_ref[:, pad:pad + F, pad:pad + W, :] = (
            a_ref[...].astype(xpad_ref.dtype))

    def depthwise(proj_ids):
        # KxK depthwise + bias + ReLU for every projection sharing this input.
        # Only K misaligned sublane slices (one per kw column); each band is
        # reused for all kh rows and all projections.
        accs = [None] * len(proj_ids)
        for kw in range(K):
            band = xpad_ref[:, :, kw:kw + W, :]                 # (BB,Fp,W,C) f32
            for kh in range(K):
                tap = band[:, kh:kh + F, :, :]                  # (BB,F,W,C)
                for i, j in enumerate(proj_ids):
                    t = tap * dww[j, kh * K + kw]               # * (1, C)
                    accs[i] = t if accs[i] is None else accs[i] + t
        outs = []
        for i, j in enumerate(proj_ids):
            h = jnp.maximum(accs[i] + dwb[j], 0.0)              # bias + ReLU
            outs.append(h.reshape(M, C).astype(mm_dtype))       # MXU input dtype
        return outs

    def pointwise_store(h, j, o_ref):
        # Pointwise 1x1 conv as one large-M matmul, then head-major stores
        # (kills the wrapper-side split_heads transpose HBM pass).
        y = jnp.dot(h, pww[j], preferred_element_type=jnp.float32) + pwb[j]
        for hd in range(heads):
            o_ref[:, hd:hd + 1, :, :] = (
                y[:, hd * dim_head:(hd + 1) * dim_head]
                .reshape(BB, 1, N, dim_head).astype(o_ref.dtype))

    if shared:                       # attn_kv is None: q/k/v share one input
        load_pad(x_ref)
        hq, hk, hv = depthwise((0, 1, 2))
        pointwise_store(hq, 0, q_ref)
        pointwise_store(hk, 1, k_ref)
        pointwise_store(hv, 2, v_ref)
    else:                            # q from x, k/v from attn_kv
        load_pad(x_ref)
        (hq,) = depthwise((0,))
        pointwise_store(hq, 0, q_ref)
        load_pad(xkv_ref)
        hk, hv = depthwise((1, 2))
        pointwise_store(hk, 1, k_ref)
        pointwise_store(hv, 2, v_ref)


# ------------------------------------------------------------------
# Generation-aware VMEM budgeting
# ------------------------------------------------------------------
def _physical_vmem_bytes():
    try:
        info = pltpu.get_tpu_info()
        cap = getattr(info, "vmem_capacity_bytes", None)
        if cap:
            return int(cap)
    except Exception:
        pass
    return 64 * 2**20      # conservative fallback (v7x per-TensorCore VMEM)


def _round_up(n, m):
    return ((n + m - 1) // m) * m


def _pick_batch_block(B, f, w, C, inner, heads, dim_head, n_inputs,
                      act_itemsize, pad, budget_bytes):
    """Images per grid step, from a (8,128)-tile-padding-aware VMEM estimate."""
    lane = lambda n: _round_up(n, 128)
    pack = max(1, 4 // act_itemsize)              # sublane packing of act dtype
    sub_a = lambda n: _round_up(n, 8 * pack)
    sub_f = lambda n: _round_up(n, 8)             # f32 sublanes
    Fp, Wp = f + 2 * pad, w + 2 * pad
    N = f * w

    per_img = 0
    # double-buffered unpadded activation input blocks (model dtype)
    per_img += n_inputs * 2 * f * sub_a(w) * lane(C) * act_itemsize
    # in-kernel zero-padded f32 activation scratch
    per_img += Fp * sub_f(Wp) * lane(C) * 4
    # depthwise band + up to 3 f32 accumulators + relu outputs
    per_img += 7 * Fp * sub_f(w) * lane(C) * 4
    # matmul inputs h (model dtype) and f32 results y (up to 3 live)
    per_img += 3 * sub_a(N) * lane(C) * act_itemsize
    per_img += 3 * sub_f(N) * lane(inner) * 4
    # double-buffered (BB, heads, N, dim_head) output blocks (model dtype)
    per_img += 3 * 2 * heads * sub_a(N) * lane(dim_head) * act_itemsize

    bb = max(1, min(B, budget_bytes // max(per_img, 1)))
    # keep >= 2 grid steps so the "parallel" batch axis can shard across the
    # two v7x TensorCores (and the pipeline has something to overlap)
    bb = min(bb, max(1, B // 2))
    while B % bb:
        bb -= 1
    return bb


# ------------------------------------------------------------------
# ConvProjectionModule forward
# ------------------------------------------------------------------
def conv_projection_forward(x, params, *, heads, kernel_size=3, attn_kv=None):
    """x: (B, N, C) with N a perfect square.  Returns (q, k, v), each of shape
    (B, heads, N, dim_head) — matches ConvProjectionModule.forward."""
    B, Nseq, C = x.shape
    K = kernel_size
    assert K % 2 == 1, "only odd kernel_size gives symmetric 'same' padding"
    f = int(round(math.sqrt(Nseq)))
    assert f * f == Nseq, "sequence length must be a perfect square"
    w = f
    pad = (K - 1) // 2
    Fp, Wp = f + 2 * pad, w + 2 * pad

    names = ("to_q", "to_k", "to_v")
    inner = params["to_q"]["pw_w"].shape[1]
    dim_head = inner // heads
    act_dtype = x.dtype

    # Stack per-projection parameters once (tiny glue).  Depthwise weights /
    # biases stay f32 (exact VPU path); pointwise weights follow the model
    # dtype so the MXU sees bf16 x bf16 (f32 accumulation) for bf16 models.
    dww = jnp.stack([params[n]["dw_w"] for n in names]) \
             .reshape(3, K * K, 1, C).astype(jnp.float32)
    dwb = jnp.stack([params[n]["dw_b"] for n in names]) \
             .reshape(3, 1, C).astype(jnp.float32)
    pww = jnp.stack([params[n]["pw_w"] for n in names]).astype(act_dtype)
    pwb = jnp.stack([params[n]["pw_b"] for n in names]) \
             .reshape(3, 1, inner).astype(jnp.float32)

    shared = attn_kv is None
    # 'b (f w) c -> b f w c' is a free reshape; zero padding happens in-kernel.
    acts = [x.reshape(B, f, w, C)]
    if not shared:
        acts.append(attn_kv.reshape(B, f, w, C))

    phys_vmem = _physical_vmem_bytes()
    vmem_limit = max(32 * 2**20, min(int(phys_vmem * 0.75), 96 * 2**20))
    BB = _pick_batch_block(B, f, w, C, inner, heads, dim_head,
                           n_inputs=len(acts),
                           act_itemsize=jnp.dtype(act_dtype).itemsize,
                           pad=pad,
                           budget_bytes=int(vmem_limit * 0.75))

    act_spec = pl.BlockSpec((BB, f, w, C), lambda b: (b, 0, 0, 0))
    in_specs = [act_spec] * len(acts) + [
        pl.BlockSpec((3, K * K, 1, C), lambda b: (0, 0, 0, 0)),
        pl.BlockSpec((3, 1, C), lambda b: (0, 0, 0)),
        pl.BlockSpec((3, C, inner), lambda b: (0, 0, 0)),
        pl.BlockSpec((3, 1, inner), lambda b: (0, 0, 0)),
    ]
    out_spec = pl.BlockSpec((BB, heads, Nseq, dim_head),
                            lambda b: (b, 0, 0, 0))
    out_sds = jax.ShapeDtypeStruct((B, heads, Nseq, dim_head), act_dtype)

    kernel = functools.partial(_fused_qkv_kernel, F=f, W=w, C=C, K=K,
                               heads=heads, dim_head=dim_head, shared=shared)

    q, k, v = pl.pallas_call(
        kernel,
        out_shape=(out_sds, out_sds, out_sds),
        grid_spec=pltpu.PrefetchScalarGridSpec(
            num_scalar_prefetch=0,
            grid=(B // BB,),
            in_specs=in_specs,
            out_specs=[out_spec, out_spec, out_spec],
            scratch_shapes=[pltpu.VMEM((BB, Fp, Wp, C), jnp.float32)],
        ),
        compiler_params=pltpu.CompilerParams(
            # batch blocks are independent -> shardable across both v7x cores
            dimension_semantics=("parallel",),
            vmem_limit_bytes=vmem_limit),
    )(*acts, dww, dwb, pww, pwb)

    return q, k, v


# ------------------------------------------------------------------
# Deterministic parameter init (shapes match the PyTorch module)
# ------------------------------------------------------------------
def init_params(key, dim, heads, dim_head, kernel_size=3):
    inner = heads * dim_head
    params = {}
    keys = jax.random.split(key, 12)
    for i, name in enumerate(("to_q", "to_k", "to_v")):
        k0, k1, k2, k3 = keys[4 * i: 4 * i + 4]
        params[name] = {
            # PyTorch depthwise weight: (dim, 1, K, K)   -> ours: (K, K, dim)
            "dw_w": 0.2 * jax.random.normal(
                k0, (kernel_size, kernel_size, dim), jnp.float32),
            "dw_b": 0.1 * jax.random.normal(k1, (dim,), jnp.float32),
            # PyTorch pointwise weight: (inner, dim, 1, 1) -> ours: (dim, inner)
            "pw_w": 0.2 * jax.random.normal(k2, (dim, inner), jnp.float32),
            "pw_b": 0.1 * jax.random.normal(k3, (inner,), jnp.float32),
        }
    return params


# ------------------------------------------------------------------
# Pure-JAX reference (lax.conv) for correctness checks
# ------------------------------------------------------------------
def _ref_sepconv(x_img, p, kernel_size=3):
    B, F, W, C = x_img.shape
    K = kernel_size
    pad = (K - 1) // 2
    x_nchw = jnp.transpose(x_img, (0, 3, 1, 2))
    dw = jnp.transpose(p["dw_w"], (2, 0, 1))[:, None]             # (C, 1, K, K)
    y = jax.lax.conv_general_dilated(
        x_nchw, dw, window_strides=(1, 1), padding=[(pad, pad), (pad, pad)],
        feature_group_count=C,
        dimension_numbers=("NCHW", "OIHW", "NCHW"))
    y = y + p["dw_b"][None, :, None, None]
    y = jnp.maximum(y, 0.0)
    pw = jnp.transpose(p["pw_w"], (1, 0))[:, :, None, None]       # (inner,C,1,1)
    z = jax.lax.conv_general_dilated(
        y, pw, window_strides=(1, 1), padding="VALID",
        dimension_numbers=("NCHW", "OIHW", "NCHW"))
    z = z + p["pw_b"][None, :, None, None]                        # (B,inner,F,W)
    return jnp.transpose(z, (0, 2, 3, 1)).reshape(B, F * W, -1)   # (B,N,inner)


if __name__ == "__main__":
    # Small shapes consistent with the module: x is (B, N, dim), N square.
    B, dim, heads, dim_head = 2, 4, 2, 8
    f = w = 8
    N = f * w

    key = jax.random.PRNGKey(0)
    kx, kkv, kp = jax.random.split(key, 3)
    x = jax.random.normal(kx, (B, N, dim), jnp.float32)
    attn_kv = jax.random.normal(kkv, (B, N, dim), jnp.float32)
    params = init_params(kp, dim, heads, dim_head)

    def ref_proj(inp, name):
        r = _ref_sepconv(inp.reshape(B, f, w, dim), params[name])
        return jnp.transpose(r.reshape(B, N, heads, dim_head), (0, 2, 1, 3))

    # Path 1: self projections (attn_kv=None -> single fused activation input)
    q, k, v = conv_projection_forward(x, params, heads=heads)
    q, k, v = jax.block_until_ready((q, k, v))
    assert q.shape == k.shape == v.shape == (B, heads, N, dim_head)
    assert jnp.allclose(q, ref_proj(x, "to_q"), atol=1e-4, rtol=1e-4), "q mismatch"
    assert jnp.allclose(k, ref_proj(x, "to_k"), atol=1e-4, rtol=1e-4), "k mismatch"
    assert jnp.allclose(v, ref_proj(x, "to_v"), atol=1e-4, rtol=1e-4), "v mismatch"

    # Path 2: cross projections (distinct attn_kv -> two activation inputs)
    q2, k2, v2 = conv_projection_forward(x, params, heads=heads, attn_kv=attn_kv)
    q2, k2, v2 = jax.block_until_ready((q2, k2, v2))
    assert jnp.allclose(q2, ref_proj(x, "to_q"), atol=1e-4, rtol=1e-4), "q2 mismatch"
    assert jnp.allclose(k2, ref_proj(attn_kv, "to_k"), atol=1e-4, rtol=1e-4), "k2 mismatch"
    assert jnp.allclose(v2, ref_proj(attn_kv, "to_v"), atol=1e-4, rtol=1e-4), "v2 mismatch"

    # Path 3: bf16 model dtype -> bf16-fed MXU path (loose check vs f32 result)
    qb, kb, vb = conv_projection_forward(x.astype(jnp.bfloat16), params, heads=heads)
    qb, kb, vb = jax.block_until_ready((qb, kb, vb))
    assert qb.dtype == jnp.bfloat16 and qb.shape == (B, heads, N, dim_head)
    assert float(jnp.max(jnp.abs(qb.astype(jnp.float32) - q))) < 0.1, "bf16 q drift"

    print("KERNEL_OK")
</pallas_src>

<mosaic_0001>
module attributes {stable_mosaic.version = 11 : i64} {
  func.func @_fused_qkv_kernel(%arg0: i32, %arg1: memref<1x8x8x4xf32, #tpu.memory_space<vmem>>, %arg2: memref<3x9x1x4xf32, #tpu.memory_space<vmem>>, %arg3: memref<3x1x4xf32, #tpu.memory_space<vmem>>, %arg4: memref<3x4x16xf32, #tpu.memory_space<vmem>>, %arg5: memref<3x1x16xf32, #tpu.memory_space<vmem>>, %arg6: memref<1x2x64x8xf32, #tpu.memory_space<vmem>>, %arg7: memref<1x2x64x8xf32, #tpu.memory_space<vmem>>, %arg8: memref<1x2x64x8xf32, #tpu.memory_space<vmem>>, %arg9: memref<1x10x10x4xf32, #tpu.memory_space<vmem>>) attributes {dimension_semantics = [#tpu.dimension_semantics<parallel>], iteration_bounds = array<i64: 2>, scalar_prefetch = 0 : i64, scratch_operands = 1 : i64, tpu.core_type = #tpu.core_type<tc>, window_params = [{transform_indices = @transform_0, window_bounds = array<i64: 1, 8, 8, 4>}, {pipeline_mode = #tpu.pipeline_mode<synchronous>, transform_indices = @transform_1, window_bounds = array<i64: 3, 9, 1, 4>}, {pipeline_mode = #tpu.pipeline_mode<synchronous>, transform_indices = @transform_2, window_bounds = array<i64: 3, 1, 4>}, {pipeline_mode = #tpu.pipeline_mode<synchronous>, transform_indices = @transform_3, window_bounds = array<i64: 3, 4, 16>}, {pipeline_mode = #tpu.pipeline_mode<synchronous>, transform_indices = @transform_4, window_bounds = array<i64: 3, 1, 16>}, {transform_indices = @transform_5, window_bounds = array<i64: 1, 2, 64, 8>}, {transform_indices = @transform_6, window_bounds = array<i64: 1, 2, 64, 8>}, {transform_indices = @transform_7, window_bounds = array<i64: 1, 2, 64, 8>}]} {
    %c0 = arith.constant 0 : index
    %c0_0 = arith.constant 0 : index
    %c0_1 = arith.constant 0 : index
    %c0_2 = arith.constant 0 : index
    %0 = vector.load %arg2[%c0, %c0_0, %c0_1, %c0_2] : memref<3x9x1x4xf32, #tpu.memory_space<vmem>>, vector<3x9x1x4xf32>
    %c0_3 = arith.constant 0 : index
    %c0_4 = arith.constant 0 : index
    %c0_5 = arith.constant 0 : index
    %1 = vector.load %arg3[%c0_3, %c0_4, %c0_5] : memref<3x1x4xf32, #tpu.memory_space<vmem>>, vector<3x1x4xf32>
    %c0_6 = arith.constant 0 : index
    %c0_7 = arith.constant 0 : index
    %c0_8 = arith.constant 0 : index
    %2 = vector.load %arg4[%c0_6, %c0_7, %c0_8] : memref<3x4x16xf32, #tpu.memory_space<vmem>>, vector<3x4x16xf32>
    %c0_9 = arith.constant 0 : index
    %c0_10 = arith.constant 0 : index
    %c0_11 = arith.constant 0 : index
    %3 = vector.load %arg5[%c0_9, %c0_10, %c0_11] : memref<3x1x16xf32, #tpu.memory_space<vmem>>, vector<3x1x16xf32>
    %cst = arith.constant 0.000000e+00 : f32
    %4 = vector.broadcast %cst : f32 to vector<1x10x10x4xf32>
    %c0_12 = arith.constant 0 : index
    %c0_13 = arith.constant 0 : index
    %c0_14 = arith.constant 0 : index
    %c0_15 = arith.constant 0 : index
    %5 = vector.load %arg9[%c0_12, %c0_13, %c0_14, %c0_15] : memref<1x10x10x4xf32, #tpu.memory_space<vmem>>, vector<1x10x10x4xf32>
    tpu.vector_store %arg9[%c0_12, %c0_13, %c0_14, %c0_15], %4 {strides = array<i32>} : memref<1x10x10x4xf32, #tpu.memory_space<vmem>>, vector<1x10x10x4xf32>,
    %c0_16 = arith.constant 0 : index
    %c0_17 = arith.constant 0 : index
    %c0_18 = arith.constant 0 : index
    %c0_19 = arith.constant 0 : index
    %6 = vector.load %arg1[%c0_16, %c0_17, %c0_18, %c0_19] : memref<1x8x8x4xf32, #tpu.memory_space<vmem>>, vector<1x8x8x4xf32>
    %c0_20 = arith.constant 0 : index
    %c1 = arith.constant 1 : index
    %c1_21 = arith.constant 1 : index
    %c0_22 = arith.constant 0 : index
    %7 = vector.load %arg9[%c0_20, %c1, %c1_21, %c0_22] : memref<1x10x10x4xf32, #tpu.memory_space<vmem>>, vector<1x8x8x4xf32>
    tpu.vector_store %arg9[%c0_20, %c1, %c1_21, %c0_22], %6 {strides = array<i32>} : memref<1x10x10x4xf32, #tpu.memory_space<vmem>>, vector<1x8x8x4xf32>,
    %c0_23 = arith.constant 0 : index
    %c0_24 = arith.constant 0 : index
    %c0_25 = arith.constant 0 : index
    %c0_26 = arith.constant 0 : index
    %8 = vector.load %arg9[%c0_23, %c0_24, %c0_25, %c0_26] : memref<1x10x10x4xf32, #tpu.memory_space<vmem>>, vector<1x10x8x4xf32>
    %9 = vector.extract_strided_slice %8 {offsets = [0, 0, 0, 0], sizes = [1, 8, 8, 4], strides = [1, 1, 1, 1]} : vector<1x10x8x4xf32> to vector<1x8x8x4xf32>
    %10 = vector.extract_strided_slice %0 {offsets = [0, 0, 0, 0], sizes = [1, 1, 1, 4], strides = [1, 1, 1, 1]} : vector<3x9x1x4xf32> to vector<1x1x1x4xf32>
    %11 = vector.shape_cast %10 : vector<1x1x1x4xf32> to vector<1x4xf32>
    %12 = vector.shape_cast %11 : vector<1x4xf32> to vector<1x1x1x4xf32>
    %13 = vector.broadcast %12 : vector<1x1x1x4xf32> to vector<1x8x8x4xf32>
    %14 = arith.mulf %9, %13 : vector<1x8x8x4xf32>
    %15 = vector.extract_strided_slice %0 {offsets = [1, 0, 0, 0], sizes = [1, 1, 1, 4], strides = [1, 1, 1, 1]} : vector<3x9x1x4xf32> to vector<1x1x1x4xf32>
    %16 = vector.shape_cast %15 : vector<1x1x1x4xf32> to vector<1x4xf32>
    %17 = vector.shape_cast %16 : vector<1x4xf32> to vector<1x1x1x4xf32>
    %18 = vector.broadcast %17 : vector<1x1x1x4xf32> to vector<1x8x8x4xf32>
    %19 = arith.mulf %9, %18 : vector<1x8x8x4xf32>
    %20 = vector.extract_strided_slice %0 {offsets = [2, 0, 0, 0], sizes = [1, 1, 1, 4], strides = [1, 1, 1, 1]} : vector<3x9x1x4xf32> to vector<1x1x1x4xf32>
    %21 = vector.shape_cast %20 : vector<1x1x1x4xf32> to vector<1x4xf32>
    %22 = vector.shape_cast %21 : vector<1x4xf32> to vector<1x1x1x4xf32>
    %23 = vector.broadcast %22 : vector<1x1x1x4xf32> to vector<1x8x8x4xf32>
    %24 = arith.mulf %9, %23 : vector<1x8x8x4xf32>
    %25 = vector.extract_strided_slice %8 {offsets = [0, 1, 0, 0], sizes = [1, 8, 8, 4], strides = [1, 1, 1, 1]} : vector<1x10x8x4xf32> to vector<1x8x8x4xf32>
    %26 = vector.extract_strided_slice %0 {offsets = [0, 3, 0, 0], sizes = [1, 1, 1, 4], strides = [1, 1, 1, 1]} : vector<3x9x1x4xf32> to vector<1x1x1x4xf32>
    %27 = vector.shape_cast %26 : vector<1x1x1x4xf32> to vector<1x4xf32>
    %28 = vector.shape_cast %27 : vector<1x4xf32> to vector<1x1x1x4xf32>
    %29 = vector.broadcast %28 : vector<1x1x1x4xf32> to vector<1x8x8x4xf32>
    %30 = arith.mulf %25, %29 : vector<1x8x8x4xf32>
    %31 = arith.addf %14, %30 : vector<1x8x8x4xf32>
    %32 = vector.extract_strided_slice %0 {offsets = [1, 3, 0, 0], sizes = [1, 1, 1, 4], strides = [1, 1, 1, 1]} : vector<3x9x1x4xf32> to vector<1x1x1x4xf32>
    %33 = vector.shape_cast %32 : vector<1x1x1x4xf32> to vector<1x4xf32>
    %34 = vector.shape_cast %33 : vector<1x4xf32> to vector<1x1x1x4xf32>
    %35 = vector.broadcast %34 : vector<1x1x1x4xf32> to vector<1x8x8x4xf32>
    %36 = arith.mulf %25, %35 : vector<1x8x8x4xf32>
    %37 = arith.addf %19, %36 : vector<1x8x8x4xf32>
    %38 = vector.extract_strided_slice %0 {offsets = [2, 3, 0, 0], sizes = [1, 1, 1, 4], strides = [1, 1, 1, 1]} : vector<3x9x1x4xf32> to vector<1x1x1x4xf32>
    %39 = vector.shape_cast %38 : vector<1x1x1x4xf32> to vector<1x4xf32>
    %40 = vector.shape_cast %39 : vector<1x4xf32> to vector<1x1x1x4xf32>
    %41 = vector.broadcast %40 : vector<1x1x1x4xf32> to vector<1x8x8x4xf32>
    %42 = arith.mulf %25, %41 : vector<1x8x8x4xf32>
    %43 = arith.addf %24, %42 : vector<1x8x8x4xf32>
    %44 = vector.extract_strided_slice %8 {offsets = [0, 2, 0, 0], sizes = [1, 8, 8, 4], strides = [1, 1, 1, 1]} : vector<1x10x8x4xf32> to vector<1x8x8x4xf32>
    %45 = vector.extract_strided_slice %0 {offsets = [0, 6, 0, 0], sizes = [1, 1, 1, 4], strides = [1, 1, 1, 1]} : vector<3x9x1x4xf32> to vector<1x1x1x4xf32>
    %46 = vector.shape_cast %45 : vector<1x1x1x4xf32> to vector<1x4xf32>
    %47 = vector.shape_cast %46 : vector<1x4xf32> to vector<1x1x1x4xf32>
    %48 = vector.broadcast %47 : vector<1x1x1x4xf32> to vector<1x8x8x4xf32>
    %49 = arith.mulf %44, %48 : vector<1x8x8x4xf32>
    %50 = arith.addf %31, %49 : vector<1x8x8x4xf32>
    %51 = vector.extract_strided_slice %0 {offsets = [1, 6, 0, 0], sizes = [1, 1, 1, 4], strides = [1, 1, 1, 1]} : vector<3x9x1x4xf32> to vector<1x1x1x4xf32>
    %52 = vector.shape_cast %51 : vector<1x1x1x4xf32> to vector<1x4xf32>
    %53 = vector.shape_cast %52 : vector<1x4xf32> to vector<1x1x1x4xf32>
    %54 = vector.broadcast %53 : vector<1x1x1x4xf32> to vector<1x8x8x4xf32>
    %55 = arith.mulf %44, %54 : vector<1x8x8x4xf32>
    %56 = arith.addf %37, %55 : vector<1x8x8x4xf32>
    %57 = vector.extract_strided_slice %0 {offsets = [2, 6, 0, 0], sizes = [1, 1, 1, 4], strides = [1, 1, 1, 1]} : vector<3x9x1x4xf32> to vector<1x1x1x4xf32>
    %58 = vector.shape_cast %57 : vector<1x1x1x4xf32> to vector<1x4xf32>
    %59 = vector.shape_cast %58 : vector<1x4xf32> to vector<1x1x1x4xf32>
    %60 = vector.broadcast %59 : vector<1x1x1x4xf32> to vector<1x8x8x4xf32>
    %61 = arith.mulf %44, %60 : vector<1x8x8x4xf32>
    %62 = arith.addf %43, %61 : vector<1x8x8x4xf32>
    %c0_27 = arith.constant 0 : index
    %c0_28 = arith.constant 0 : index
    %c1_29 = arith.constant 1 : index
    %c0_30 = arith.constant 0 : index
    %63 = vector.load %arg9[%c0_27, %c0_28, %c1_29, %c0_30] : memref<1x10x10x4xf32, #tpu.memory_space<vmem>>, vector<1x10x8x4xf32>
    %64 = vector.extract_strided_slice %63 {offsets = [0, 0, 0, 0], sizes = [1, 8, 8, 4], strides = [1, 1, 1, 1]} : vector<1x10x8x4xf32> to vector<1x8x8x4xf32>
    %65 = vector.extract_strided_slice %0 {offsets = [0, 1, 0, 0], sizes = [1, 1, 1, 4], strides = [1, 1, 1, 1]} : vector<3x9x1x4xf32> to vector<1x1x1x4xf32>
    %66 = vector.shape_cast %65 : vector<1x1x1x4xf32> to vector<1x4xf32>
    %67 = vector.shape_cast %66 : vector<1x4xf32> to vector<1x1x1x4xf32>
    %68 = vector.broadcast %67 : vector<1x1x1x4xf32> to vector<1x8x8x4xf32>
    %69 = arith.mulf %64, %68 : vector<1x8x8x4xf32>
    %70 = arith.addf %50, %69 : vector<1x8x8x4xf32>
    %71 = vector.extract_strided_slice %0 {offsets = [1, 1, 0, 0], sizes = [1, 1, 1, 4], strides = [1, 1, 1, 1]} : vector<3x9x1x4xf32> to vector<1x1x1x4xf32>
    %72 = vector.shape_cast %71 : vector<1x1x1x4xf32> to vector<1x4xf32>
    %73 = vector.shape_cast %72 : vector<1x4xf32> to vector<1x1x1x4xf32>
    %74 = vector.broadcast %73 : vector<1x1x1x4xf32> to vector<1x8x8x4xf32>
    %75 = arith.mulf %64, %74 : vector<1x8x8x4xf32>
    %76 = arith.addf %56, %75 : vector<1x8x8x4xf32>
    %77 = vector.extract_strided_slice %0 {offsets = [2, 1, 0, 0], sizes = [1, 1, 1, 4], strides = [1, 1, 1, 1]} : vector<3x9x1x4xf32> to vector<1x1x1x4xf32>
    %78 = vector.shape_cast %77 : vector<1x1x1x4xf32> to vector<1x4xf32>
    %79 = vector.shape_cast %78 : vector<1x4xf32> to vector<1x1x1x4xf32>
    %80 = vector.broadcast %79 : vector<1x1x1x4xf32> to vector<1x8x8x4xf32>
    %81 = arith.mulf %64, %80 : vector<1x8x8x4xf32>
    %82 = arith.addf %62, %81 : vector<1x8x8x4xf32>
    %83 = vector.extract_strided_slice %63 {offsets = [0, 1, 0, 0], sizes = [1, 8, 8, 4], strides = [1, 1, 1, 1]} : vector<1x10x8x4xf32> to vector<1x8x8x4xf32>
    %84 = vector.extract_strided_slice %0 {offsets = [0, 4, 0, 0], sizes = [1, 1, 1, 4], strides = [1, 1, 1, 1]} : vector<3x9x1x4xf32> to vector<1x1x1x4xf32>
    %85 = vector.shape_cast %84 : vector<1x1x1x4xf32> to vector<1x4xf32>
    %86 = vector.shape_cast %85 : vector<1x4xf32> to vector<1x1x1x4xf32>
    %87 = vector.broadcast %86 : vector<1x1x1x4xf32> to vector<1x8x8x4xf32>
    %88 = arith.mulf %83, %87 : vector<1x8x8x4xf32>
    %89 = arith.addf %70, %88 : vector<1x8x8x4xf32>
    %90 = vector.extract_strided_slice %0 {offsets = [1, 4, 0, 0], sizes = [1, 1, 1, 4], strides = [1, 1, 1, 1]} : vector<3x9x1x4xf32> to vector<1x1x1x4xf32>
    %91 = vector.shape_cast %90 : vector<1x1x1x4xf32> to vector<1x4xf32>
    %92 = vector.shape_cast %91 : vector<1x4xf32> to vector<1x1x1x4xf32>
    %93 = vector.broadcast %92 : vector<1x1x1x4xf32> to vector<1x8x8x4xf32>
    %94 = arith.mulf %83, %93 : vector<1x8x8x4xf32>
    %95 = arith.addf %76, %94 : vector<1x8x8x4xf32>
    %96 = vector.extract_strided_slice %0 {offsets = [2, 4, 0, 0], sizes = [1, 1, 1, 4], strides = [1, 1, 1, 1]} : vector<3x9x1x4xf32> to vector<1x1x1x4xf32>
    %97 = vector.shape_cast %96 : vector<1x1x1x4xf32> to vector<1x4xf32>
    %98 = vector.shape_cast %97 : vector<1x4xf32> to vector<1x1x1x4xf32>
    %99 = vector.broadcast %98 : vector<1x1x1x4xf32> to vector<1x8x8x4xf32>
    %100 = arith.mulf %83, %99 : vector<1x8x8x4xf32>
    %101 = arith.addf %82, %100 : vector<1x8x8x4xf32>
    %102 = vector.extract_strided_slice %63 {offsets = [0, 2, 0, 0], sizes = [1, 8, 8, 4], strides = [1, 1, 1, 1]} : vector<1x10x8x4xf32> to vector<1x8x8x4xf32>
    %103 = vector.extract_strided_slice %0 {offsets = [0, 7, 0, 0], sizes = [1, 1, 1, 4], strides = [1, 1, 1, 1]} : vector<3x9x1x4xf32> to vector<1x1x1x4xf32>
    %104 = vector.shape_cast %103 : vector<1x1x1x4xf32> to vector<1x4xf32>
    %105 = vector.shape_cast %104 : vector<1x4xf32> to vector<1x1x1x4xf32>
    %106 = vector.broadcast %105 : vector<1x1x1x4xf32> to vector<1x8x8x4xf32>
    %107 = arith.mulf %102, %106 : vector<1x8x8x4xf32>
    %108 = arith.addf %89, %107 : vector<1x8x8x4xf32>
    %109 = vector.extract_strided_slice %0 {offsets = [1, 7, 0, 0], sizes = [1, 1, 1, 4], strides = [1, 1, 1, 1]} : vector<3x9x1x4xf32> to vector<1x1x1x4xf32>
    %110 = vector.shape_cast %109 : vector<1x1x1x4xf32> to vector<1x4xf32>
    %111 = vector.shape_cast %110 : vector<1x4xf32> to vector<1x1x1x4xf32>
    %112 = vector.broadcast %111 : vector<1x1x1x4xf32> to vector<1x8x8x4xf32>
    %113 = arith.mulf %102, %112 : vector<1x8x8x4xf32>
    %114 = arith.addf %95, %113 : vector<1x8x8x4xf32>
    %115 = vector.extract_strided_slice %0 {offsets = [2, 7, 0, 0], sizes = [1, 1, 1, 4], strides = [1, 1, 1, 1]} : vector<3x9x1x4xf32> to vector<1x1x1x4xf32>
    %116 = vector.shape_cast %115 : vector<1x1x1x4xf32> to vector<1x4xf32>
    %117 = vector.shape_cast %116 : vector<1x4xf32> to vector<1x1x1x4xf32>
    %118 = vector.broadcast %117 : vector<1x1x1x4xf32> to vector<1x8x8x4xf32>
    %119 = arith.mulf %102, %118 : vector<1x8x8x4xf32>
    %120 = arith.addf %101, %119 : vector<1x8x8x4xf32>
    %c0_31 = arith.constant 0 : index
    %c0_32 = arith.constant 0 : index
    %c2 = arith.constant 2 : index
    %c0_33 = arith.constant 0 : index
    %121 = vector.load %arg9[%c0_31, %c0_32, %c2, %c0_33] : memref<1x10x10x4xf32, #tpu.memory_space<vmem>>, vector<1x10x8x4xf32>
    %122 = vector.extract_strided_slice %121 {offsets = [0, 0, 0, 0], sizes = [1, 8, 8, 4], strides = [1, 1, 1, 1]} : vector<1x10x8x4xf32> to vector<1x8x8x4xf32>
    %123 = vector.extract_strided_slice %0 {offsets = [0, 2, 0, 0], sizes = [1, 1, 1, 4], strides = [1, 1, 1, 1]} : vector<3x9x1x4xf32> to vector<1x1x1x4xf32>
    %124 = vector.shape_cast %123 : vector<1x1x1x4xf32> to vector<1x4xf32>
    %125 = vector.shape_cast %124 : vector<1x4xf32> to vector<1x1x1x4xf32>
    %126 = vector.broadcast %125 : vector<1x1x1x4xf32> to vector<1x8x8x4xf32>
    %127 = arith.mulf %122, %126 : vector<1x8x8x4xf32>
    %128 = arith.addf %108, %127 : vector<1x8x8x4xf32>
    %129 = vector.extract_strided_slice %0 {offsets = [1, 2, 0, 0], sizes = [1, 1, 1, 4], strides = [1, 1, 1, 1]} : vector<3x9x1x4xf32> to vector<1x1x1x4xf32>
    %130 = vector.shape_cast %129 : vector<1x1x1x4xf32> to vector<1x4xf32>
    %131 = vector.shape_cast %130 : vector<1x4xf32> to vector<1x1x1x4xf32>
    %132 = vector.broadcast %131 : vector<1x1x1x4xf32> to vector<1x8x8x4xf32>
    %133 = arith.mulf %122, %132 : vector<1x8x8x4xf32>
    %134 = arith.addf %114, %133 : vector<1x8x8x4xf32>
    %135 = vector.extract_strided_slice %0 {offsets = [2, 2, 0, 0], sizes = [1, 1, 1, 4], strides = [1, 1, 1, 1]} : vector<3x9x1x4xf32> to vector<1x1x1x4xf32>
    %136 = vector.shape_cast %135 : vector<1x1x1x4xf32> to vector<1x4xf32>
    %137 = vector.shape_cast %136 : vector<1x4xf32> to vector<1x1x1x4xf32>
    %138 = vector.broadcast %137 : vector<1x1x1x4xf32> to vector<1x8x8x4xf32>
    %139 = arith.mulf %122, %138 : vector<1x8x8x4xf32>
    %140 = arith.addf %120, %139 : vector<1x8x8x4xf32>
    %141 = vector.extract_strided_slice %121 {offsets = [0, 1, 0, 0], sizes = [1, 8, 8, 4], strides = [1, 1, 1, 1]} : vector<1x10x8x4xf32> to vector<1x8x8x4xf32>
    %142 = vector.extract_strided_slice %0 {offsets = [0, 5, 0, 0], sizes = [1, 1, 1, 4], strides = [1, 1, 1, 1]} : vector<3x9x1x4xf32> to vector<1x1x1x4xf32>
    %143 = vector.shape_cast %142 : vector<1x1x1x4xf32> to vector<1x4xf32>
    %144 = vector.shape_cast %143 : vector<1x4xf32> to vector<1x1x1x4xf32>
    %145 = vector.broadcast %144 : vector<1x1x1x4xf32> to vector<1x8x8x4xf32>
    %146 = arith.mulf %141, %145 : vector<1x8x8x4xf32>
    %147 = arith.addf %128, %146 : vector<1x8x8x4xf32>
    %148 = vector.extract_strided_slice %0 {offsets = [1, 5, 0, 0], sizes = [1, 1, 1, 4], strides = [1, 1, 1, 1]} : vector<3x9x1x4xf32> to vector<1x1x1x4xf32>
    %149 = vector.shape_cast %148 : vector<1x1x1x4xf32> to vector<1x4xf32>
    %150 = vector.shape_cast %149 : vector<1x4xf32> to vector<1x1x1x4xf32>
    %151 = vector.broadcast %150 : vector<1x1x1x4xf32> to vector<1x8x8x4xf32>
    %152 = arith.mulf %141, %151 : vector<1x8x8x4xf32>
    %153 = arith.addf %134, %152 : vector<1x8x8x4xf32>
    %154 = vector.extract_strided_slice %0 {offsets = [2, 5, 0, 0], sizes = [1, 1, 1, 4], strides = [1, 1, 1, 1]} : vector<3x9x1x4xf32> to vector<1x1x1x4xf32>
    %155 = vector.shape_cast %154 : vector<1x1x1x4xf32> to vector<1x4xf32>
    %156 = vector.shape_cast %155 : vector<1x4xf32> to vector<1x1x1x4xf32>
    %157 = vector.broadcast %156 : vector<1x1x1x4xf32> to vector<1x8x8x4xf32>
    %158 = arith.mulf %141, %157 : vector<1x8x8x4xf32>
    %159 = arith.addf %140, %158 : vector<1x8x8x4xf32>
    %160 = vector.extract_strided_slice %121 {offsets = [0, 2, 0, 0], sizes = [1, 8, 8, 4], strides = [1, 1, 1, 1]} : vector<1x10x8x4xf32> to vector<1x8x8x4xf32>
    %161 = vector.extract_strided_slice %0 {offsets = [0, 8, 0, 0], sizes = [1, 1, 1, 4], strides = [1, 1, 1, 1]} : vector<3x9x1x4xf32> to vector<1x1x1x4xf32>
    %162 = vector.shape_cast %161 : vector<1x1x1x4xf32> to vector<1x4xf32>
    %163 = vector.shape_cast %162 : vector<1x4xf32> to vector<1x1x1x4xf32>
    %164 = vector.broadcast %163 : vector<1x1x1x4xf32> to vector<1x8x8x4xf32>
    %165 = arith.mulf %160, %164 : vector<1x8x8x4xf32>
    %166 = arith.addf %147, %165 : vector<1x8x8x4xf32>
    %167 = vector.extract_strided_slice %0 {offsets = [1, 8, 0, 0], sizes = [1, 1, 1, 4], strides = [1, 1, 1, 1]} : vector<3x9x1x4xf32> to vector<1x1x1x4xf32>
    %168 = vector.shape_cast %167 : vector<1x1x1x4xf32> to vector<1x4xf32>
    %169 = vector.shape_cast %168 : vector<1x4xf32> to vector<1x1x1x4xf32>
    %170 = vector.broadcast %169 : vector<1x1x1x4xf32> to vector<1x8x8x4xf32>
    %171 = arith.mulf %160, %170 : vector<1x8x8x4xf32>
    %172 = arith.addf %153, %171 : vector<1x8x8x4xf32>
    %173 = vector.extract_strided_slice %0 {offsets = [2, 8, 0, 0], sizes = [1, 1, 1, 4], strides = [1, 1, 1, 1]} : vector<3x9x1x4xf32> to vector<1x1x1x4xf32>
    %174 = vector.shape_cast %173 : vector<1x1x1x4xf32> to vector<1x4xf32>
    %175 = vector.shape_cast %174 : vector<1x4xf32> to vector<1x1x1x4xf32>
    %176 = vector.broadcast %175 : vector<1x1x1x4xf32> to vector<1x8x8x4xf32>
    %177 = arith.mulf %160, %176 : vector<1x8x8x4xf32>
    %178 = arith.addf %159, %177 : vector<1x8x8x4xf32>
    %179 = vector.extract_strided_slice %1 {offsets = [0, 0, 0], sizes = [1, 1, 4], strides = [1, 1, 1]} : vector<3x1x4xf32> to vector<1x1x4xf32>
    %180 = vector.shape_cast %179 : vector<1x1x4xf32> to vector<1x4xf32>
    %181 = vector.shape_cast %180 : vector<1x4xf32> to vector<1x1x1x4xf32>
    %182 = vector.broadcast %181 : vector<1x1x1x4xf32> to vector<1x8x8x4xf32>
    %183 = arith.addf %166, %182 : vector<1x8x8x4xf32>
    %cst_34 = arith.constant 0.000000e+00 : f32
    %184 = vector.broadcast %cst_34 : f32 to vector<1x8x8x4xf32>
    %185 = arith.maximumf %183, %184 : vector<1x8x8x4xf32>
    %186 = vector.shape_cast %185 : vector<1x8x8x4xf32> to vector<64x4xf32>
    %187 = vector.extract_strided_slice %1 {offsets = [1, 0, 0], sizes = [1, 1, 4], strides = [1, 1, 1]} : vector<3x1x4xf32> to vector<1x1x4xf32>
    %188 = vector.shape_cast %187 : vector<1x1x4xf32> to vector<1x4xf32>
    %189 = vector.shape_cast %188 : vector<1x4xf32> to vector<1x1x1x4xf32>
    %190 = vector.broadcast %189 : vector<1x1x1x4xf32> to vector<1x8x8x4xf32>
    %191 = arith.addf %172, %190 : vector<1x8x8x4xf32>
    %cst_35 = arith.constant 0.000000e+00 : f32
    %192 = vector.broadcast %cst_35 : f32 to vector<1x8x8x4xf32>
    %193 = arith.maximumf %191, %192 : vector<1x8x8x4xf32>
    %194 = vector.shape_cast %193 : vector<1x8x8x4xf32> to vector<64x4xf32>
    %195 = vector.extract_strided_slice %1 {offsets = [2, 0, 0], sizes = [1, 1, 4], strides = [1, 1, 1]} : vector<3x1x4xf32> to vector<1x1x4xf32>
    %196 = vector.shape_cast %195 : vector<1x1x4xf32> to vector<1x4xf32>
    %197 = vector.shape_cast %196 : vector<1x4xf32> to vector<1x1x1x4xf32>
    %198 = vector.broadcast %197 : vector<1x1x1x4xf32> to vector<1x8x8x4xf32>
    %199 = arith.addf %178, %198 : vector<1x8x8x4xf32>
    %cst_36 = arith.constant 0.000000e+00 : f32
    %200 = vector.broadcast %cst_36 : f32 to vector<1x8x8x4xf32>
    %201 = arith.maximumf %199, %200 : vector<1x8x8x4xf32>
    %202 = vector.shape_cast %201 : vector<1x8x8x4xf32> to vector<64x4xf32>
    %203 = vector.extract_strided_slice %2 {offsets = [0, 0, 0], sizes = [1, 4, 16], strides = [1, 1, 1]} : vector<3x4x16xf32> to vector<1x4x16xf32>
    %204 = vector.shape_cast %203 : vector<1x4x16xf32> to vector<4x16xf32>
    %cst_37 = arith.constant dense<0.000000e+00> : vector<64x16xf32>
    %205 = tpu.matmul %186, %204, %cst_37 {dimension_numbers = #tpu.dot_dimension_numbers<[1], [0], [0], [1], [0, 0, 1, 1], [], []>} : vector<64x4xf32>, vector<4x16xf32>, vector<64x16xf32> -> vector<64x16xf32>
    %206 = vector.extract_strided_slice %3 {offsets = [0, 0, 0], sizes = [1, 1, 16], strides = [1, 1, 1]} : vector<3x1x16xf32> to vector<1x1x16xf32>
    %207 = vector.shape_cast %206 : vector<1x1x16xf32> to vector<1x16xf32>
    %208 = vector.broadcast %207 : vector<1x16xf32> to vector<64x16xf32>
    %209 = arith.addf %205, %208 : vector<64x16xf32>
    %210 = vector.extract_strided_slice %209 {offsets = [0, 0], sizes = [64, 8], strides = [1, 1]} : vector<64x16xf32> to vector<64x8xf32>
    %211 = vector.shape_cast %210 : vector<64x8xf32> to vector<1x1x64x8xf32>
    %c0_38 = arith.constant 0 : index
    %c0_39 = arith.constant 0 : index
    %c0_40 = arith.constant 0 : index
    %c0_41 = arith.constant 0 : index
    %212 = vector.load %arg6[%c0_38, %c0_39, %c0_40, %c0_41] : memref<1x2x64x8xf32, #tpu.memory_space<vmem>>, vector<1x1x64x8xf32>
    tpu.vector_store %arg6[%c0_38, %c0_39, %c0_40, %c0_41], %211 {strides = array<i32>} : memref<1x2x64x8xf32, #tpu.memory_space<vmem>>, vector<1x1x64x8xf32>,
    %213 = vector.extract_strided_slice %209 {offsets = [0, 8], sizes = [64, 8], strides = [1, 1]} : vector<64x16xf32> to vector<64x8xf32>
    %214 = vector.shape_cast %213 : vector<64x8xf32> to vector<1x1x64x8xf32>
    %c0_42 = arith.constant 0 : index
    %c1_43 = arith.constant 1 : index
    %c0_44 = arith.constant 0 : index
    %c0_45 = arith.constant 0 : index
    %215 = vector.load %arg6[%c0_42, %c1_43, %c0_44, %c0_45] : memref<1x2x64x8xf32, #tpu.memory_space<vmem>>, vector<1x1x64x8xf32>
    tpu.vector_store %arg6[%c0_42, %c1_43, %c0_44, %c0_45], %214 {strides = array<i32>} : memref<1x2x64x8xf32, #tpu.memory_space<vmem>>, vector<1x1x64x8xf32>,
    %216 = vector.extract_strided_slice %2 {offsets = [1, 0, 0], sizes = [1, 4, 16], strides = [1, 1, 1]} : vector<3x4x16xf32> to vector<1x4x16xf32>
    %217 = vector.shape_cast %216 : vector<1x4x16xf32> to vector<4x16xf32>
    %cst_46 = arith.constant dense<0.000000e+00> : vector<64x16xf32>
    %218 = tpu.matmul %194, %217, %cst_46 {dimension_numbers = #tpu.dot_dimension_numbers<[1], [0], [0], [1], [0, 0, 1, 1], [], []>} : vector<64x4xf32>, vector<4x16xf32>, vector<64x16xf32> -> vector<64x16xf32>
    %219 = vector.extract_strided_slice %3 {offsets = [1, 0, 0], sizes = [1, 1, 16], strides = [1, 1, 1]} : vector<3x1x16xf32> to vector<1x1x16xf32>
    %220 = vector.shape_cast %219 : vector<1x1x16xf32> to vector<1x16xf32>
    %221 = vector.broadcast %220 : vector<1x16xf32> to vector<64x16xf32>
    %222 = arith.addf %218, %221 : vector<64x16xf32>
    %223 = vector.extract_strided_slice %222 {offsets = [0, 0], sizes = [64, 8], strides = [1, 1]} : vector<64x16xf32> to vector<64x8xf32>
    %224 = vector.shape_cast %223 : vector<64x8xf32> to vector<1x1x64x8xf32>
    %c0_47 = arith.constant 0 : index
    %c0_48 = arith.constant 0 : index
    %c0_49 = arith.constant 0 : index
    %c0_50 = arith.constant 0 : index
    %225 = vector.load %arg7[%c0_47, %c0_48, %c0_49, %c0_50] : memref<1x2x64x8xf32, #tpu.memory_space<vmem>>, vector<1x1x64x8xf32>
    tpu.vector_store %arg7[%c0_47, %c0_48, %c0_49, %c0_50], %224 {strides = array<i32>} : memref<1x2x64x8xf32, #tpu.memory_space<vmem>>, vector<1x1x64x8xf32>,
    %226 = vector.extract_strided_slice %222 {offsets = [0, 8], sizes = [64, 8], strides = [1, 1]} : vector<64x16xf32> to vector<64x8xf32>
    %227 = vector.shape_cast %226 : vector<64x8xf32> to vector<1x1x64x8xf32>
    %c0_51 = arith.constant 0 : index
    %c1_52 = arith.constant 1 : index
    %c0_53 = arith.constant 0 : index
    %c0_54 = arith.constant 0 : index
    %228 = vector.load %arg7[%c0_51, %c1_52, %c0_53, %c0_54] : memref<1x2x64x8xf32, #tpu.memory_space<vmem>>, vector<1x1x64x8xf32>
    tpu.vector_store %arg7[%c0_51, %c1_52, %c0_53, %c0_54], %227 {strides = array<i32>} : memref<1x2x64x8xf32, #tpu.memory_space<vmem>>, vector<1x1x64x8xf32>,
    %229 = vector.extract_strided_slice %2 {offsets = [2, 0, 0], sizes = [1, 4, 16], strides = [1, 1, 1]} : vector<3x4x16xf32> to vector<1x4x16xf32>
    %230 = vector.shape_cast %229 : vector<1x4x16xf32> to vector<4x16xf32>
    %cst_55 = arith.constant dense<0.000000e+00> : vector<64x16xf32>
    %231 = tpu.matmul %202, %230, %cst_55 {dimension_numbers = #tpu.dot_dimension_numbers<[1], [0], [0], [1], [0, 0, 1, 1], [], []>} : vector<64x4xf32>, vector<4x16xf32>, vector<64x16xf32> -> vector<64x16xf32>
    %232 = vector.extract_strided_slice %3 {offsets = [2, 0, 0], sizes = [1, 1, 16], strides = [1, 1, 1]} : vector<3x1x16xf32> to vector<1x1x16xf32>
    %233 = vector.shape_cast %232 : vector<1x1x16xf32> to vector<1x16xf32>
    %234 = vector.broadcast %233 : vector<1x16xf32> to vector<64x16xf32>
    %235 = arith.addf %231, %234 : vector<64x16xf32>
    %236 = vector.extract_strided_slice %235 {offsets = [0, 0], sizes = [64, 8], strides = [1, 1]} : vector<64x16xf32> to vector<64x8xf32>
    %237 = vector.shape_cast %236 : vector<64x8xf32> to vector<1x1x64x8xf32>
    %c0_56 = arith.constant 0 : index
    %c0_57 = arith.constant 0 : index
    %c0_58 = arith.constant 0 : index
    %c0_59 = arith.constant 0 : index
    %238 = vector.load %arg8[%c0_56, %c0_57, %c0_58, %c0_59] : memref<1x2x64x8xf32, #tpu.memory_space<vmem>>, vector<1x1x64x8xf32>
    tpu.vector_store %arg8[%c0_56, %c0_57, %c0_58, %c0_59], %237 {strides = array<i32>} : memref<1x2x64x8xf32, #tpu.memory_space<vmem>>, vector<1x1x64x8xf32>,
    %239 = vector.extract_strided_slice %235 {offsets = [0, 8], sizes = [64, 8], strides = [1, 1]} : vector<64x16xf32> to vector<64x8xf32>
    %240 = vector.shape_cast %239 : vector<64x8xf32> to vector<1x1x64x8xf32>
    %c0_60 = arith.constant 0 : index
    %c1_61 = arith.constant 1 : index
    %c0_62 = arith.constant 0 : index
    %c0_63 = arith.constant 0 : index
    %241 = vector.load %arg8[%c0_60, %c1_61, %c0_62, %c0_63] : memref<1x2x64x8xf32, #tpu.memory_space<vmem>>, vector<1x1x64x8xf32>
    tpu.vector_store %arg8[%c0_60, %c1_61, %c0_62, %c0_63], %240 {strides = array<i32>} : memref<1x2x64x8xf32, #tpu.memory_space<vmem>>, vector<1x1x64x8xf32>,
    return
  }
  func.func @transform_0(%arg0: i32) -> (i32, i32, i32, i32) {
    %c0_i32 = arith.constant 0 : i32
    %c0_i32_0 = arith.constant 0 : i32
    %c0_i32_1 = arith.constant 0 : i32
    %c0_i32_2 = arith.constant 0 : i32
    return %arg0, %c0_i32, %c0_i32_0, %c0_i32_1 : i32, i32, i32, i32
  }
  func.func @transform_1(%arg0: i32) -> (i32, i32, i32, i32) {
    %c0_i32 = arith.constant 0 : i32
    %c0_i32_0 = arith.constant 0 : i32
    %c0_i32_1 = arith.constant 0 : i32
    %c0_i32_2 = arith.constant 0 : i32
    %c0_i32_3 = arith.constant 0 : i32
    return %c0_i32, %c0_i32_0, %c0_i32_1, %c0_i32_2 : i32, i32, i32, i32
  }
  func.func @transform_2(%arg0: i32) -> (i32, i32, i32) {
    %c0_i32 = arith.constant 0 : i32
    %c0_i32_0 = arith.constant 0 : i32
    %c0_i32_1 = arith.constant 0 : i32
    %c0_i32_2 = arith.constant 0 : i32
    return %c0_i32, %c0_i32_0, %c0_i32_1 : i32, i32, i32
  }
  func.func @transform_3(%arg0: i32) -> (i32, i32, i32) {
    %c0_i32 = arith.constant 0 : i32
    %c0_i32_0 = arith.constant 0 : i32
    %c0_i32_1 = arith.constant 0 : i32
    %c0_i32_2 = arith.constant 0 : i32
    return %c0_i32, %c0_i32_0, %c0_i32_1 : i32, i32, i32
  }
  func.func @transform_4(%arg0: i32) -> (i32, i32, i32) {
    %c0_i32 = arith.constant 0 : i32
    %c0_i32_0 = arith.constant 0 : i32
    %c0_i32_1 = arith.constant 0 : i32
    %c0_i32_2 = arith.constant 0 : i32
    return %c0_i32, %c0_i32_0, %c0_i32_1 : i32, i32, i32
  }
  func.func @transform_5(%arg0: i32) -> (i32, i32, i32, i32) {
    %c0_i32 = arith.constant 0 : i32
    %c0_i32_0 = arith.constant 0 : i32
    %c0_i32_1 = arith.constant 0 : i32
    %c0_i32_2 = arith.constant 0 : i32
    return %arg0, %c0_i32, %c0_i32_0, %c0_i32_1 : i32, i32, i32, i32
  }
  func.func @transform_6(%arg0: i32) -> (i32, i32, i32, i32) {
    %c0_i32 = arith.constant 0 : i32
    %c0_i32_0 = arith.constant 0 : i32
    %c0_i32_1 = arith.constant 0 : i32
    %c0_i32_2 = arith.constant 0 : i32
    return %arg0, %c0_i32, %c0_i32_0, %c0_i32_1 : i32, i32, i32, i32
  }
  func.func @transform_7(%arg0: i32) -> (i32, i32, i32, i32) {
    %c0_i32 = arith.constant 0 : i32
    %c0_i32_0 = arith.constant 0 : i32
    %c0_i32_1 = arith.constant 0 : i32
    %c0_i32_2 = arith.constant 0 : i32
    return %arg0, %c0_i32, %c0_i32_0, %c0_i32_1 : i32, i32, i32, i32
  }
}

</mosaic_0001>

<bundles_post_ra>
// kernel: tpu_custom_call.1
= control target key start
LH: loop header
LB: loop body
LE: loop exit
PB: predicated region body
PF: predicated region fallthrough
CT: control target
= control target key end

     0   :  { %s1963_s24 = smov 0   ;;  %s2887_s0 = inlined_call_operand.vmem [shape: f32[2,8,8,4], index: 0, kind: input, shape index: {}]   ;;  %s2888_s1 = inlined_call_operand.vmem [shape: f32[3,9,1,4], index: 1, kind: input, shape index: {}]   ;;  %s2889_s2 = inlined_call_operand.vmem [shape: f32[3,1,4], index: 2, kind: input, shape index: {}]   ;;  %s2890_s3 = inlined_call_operand.vmem [shape: f32[3,4,16], index: 3, kind: input, shape index: {}]   ;;  %s2891_s4 = inlined_call_operand.vmem [shape: f32[3,1,16], index: 4, kind: input, shape index: {}]   ;;  %s2892_s5 = inlined_call_operand.vmem [shape: f32[2,2,64,8], index: 5, kind: output, shape index: {0}]   ;;  %s2893_s6 = inlined_call_operand.vmem [shape: f32[2,2,64,8], index: 6, kind: output, shape index: {1}]   ;;  %s2894_s7 = inlined_call_operand.vmem [shape: f32[2,2,64,8], index: 7, kind: output, shape index: {2}]  }
   0x1 LB: > { %s1729_s25 = sadd.s32 4294967295, %s1919_s24   ;;  %p1733_p0 = scmp.ge.s32.totalorder %s1919_s24, 1  ;;  %s1919_s24 = sphi %s1963_s24, %s18_s24  }
   0x2   : > { %p242_p1 = scmp.lt.s32.totalorder %s1919_s24, 3 }
   0x4   : > { %p243_p2 = pnand %p1733_p0, %p242_p1 }
   0x6   : > { %246 = sbr.rel (%p243_p2) target bundleno = 466 (0x1d2), region = 40 }
   0xb   : > { %v334_v0 = vld [vmem:[%s2890_s3] sm:$0xf]  ;;  %vm1075_vm0 = vcmask 1043456   ;;  %p284_p3 = scmp.lt.s32.totalorder %s1729_s25, 1  ;;  %vm340_vm1 = vcmask 31744   ;;  %v1921_v1 = vmov 0.0  }
   0xc   : > { %1859 = vmatprep.subr.msk.mxu0 %vm1075_vm0, %v334_v0  ;;  %1901 = vmatprep.subr.msk.mxu1 %vm1075_vm0, %v334_v0  ;;  %341 = vst.msk [vmem:[#allocation2] sm:$0xff] %vm340_vm1, %v1921_v1  ;;  %344 = vst.msk [vmem:[#allocation2 + $0x10] sm:$0xff] %vm340_vm1, %v1921_v1  ;;  %vm342_vm2 = vcmask 25600   ;;  %v2014_v10 = vld [vmem:[%s2890_s3 + $0x4] sm:$0xf]  ;;  %vm1184_vm3 = vcmask 64512  }
   0xd   : > { %1860 = vmatpush3.msk.msra.mxu0 %vm1075_vm0, %v334_v0  ;;  %1902 = vmatpush3.msk.msra.mxu1 %vm1075_vm0, %v334_v0  ;;  %s2960_s25 = smov (!%p284_p3, %s1729_s25), 1  ;;  %346 = vst.msk [vmem:[#allocation2 + $0x20] sm:$0xff] %vm340_vm1, %v1921_v1  ;;  %348 = vst.msk [vmem:[#allocation2 + $0x30] sm:$0xff] %vm340_vm1, %v1921_v1  ;;  %v2019_v11 = vld [vmem:[%s2890_s3 + $0x8] sm:$0xf] }
   0xe   : > { %s1828_s28 = sshll.u32 %s2960_s25, 6  ;;  %350 = vst.msk [vmem:[#allocation2 + $0x40] sm:$0xff] %vm340_vm1, %v1921_v1  ;;  %352 = vst.msk [vmem:[#allocation2 + $0x50] sm:$0xff] %vm340_vm1, %v1921_v1  ;;  %v2024_v12 = vld [vmem:[%s2888_s1] ss:$0 sm:$0xff]  ;;  %1873 = vmatprep.subr.msk.mxu1 %vm1075_vm0, %v2014_v10  ;;  %1887 = vmatprep.subr.msk.mxu0 %vm1075_vm0, %v2019_v11  ;;  %s2735_s10 = sshll.u32 %s2960_s25, 7 }
   0xf   : > { %s1984_s8 = scalar_lea.vmem %s2887_s0, %s1828_s28  ;;  %354 = vst.msk [vmem:[#allocation2 + $0x60] sm:$0xff] %vm340_vm1, %v1921_v1  ;;  %356 = vst.msk [vmem:[#allocation2 + $0x70] sm:$0xff] %vm340_vm1, %v1921_v1  ;;  %v2034_v13 = vld [vmem:[%s2888_s1 + $0x1] ss:$0 sm:$0xff]  ;;  %v2039_v14 = vld [vmem:[%s2888_s1 + $0x3] ss:$0 sm:$0xff]  ;;  %s2744_s15 = scalar_lea.vmem %s2892_s5, %s2735_s10 }
  0x10   : > { %358 = vst.msk [vmem:[#allocation2 + $0x80] sm:$0xff] %vm340_vm1, %v1921_v1  ;;  %360 = vst.msk [vmem:[#allocation2 + $0x90] sm:$0xff] %vm340_vm1, %v1921_v1  ;;  %v362_v2 = vld [vmem:[%s1984_s8] sm:$0xff]  ;;  %v363_v3 = vld [vmem:[%s1984_s8 + $0x8] sm:$0xff]  ;;  %s1922_s25 = smov 120   ;;  %s2776_s20 = scalar_lea.vmem %s2893_s6, %s2735_s10 }
  0x11   : > { %343 = vst.msk [vmem:[#allocation2 + $0x8] sm:$0x3] %vm342_vm2, %v1921_v1  ;;  %345 = vst.msk [vmem:[#allocation2 + $0x18] sm:$0x3] %vm342_vm2, %v1921_v1  ;;  %v365_v4 = vld [vmem:[%s1984_s8 + $0x18] sm:$0xff]  ;;  %v366_v5 = vld [vmem:[%s1984_s8 + $0x20] sm:$0xff]  ;;  %s2792_s27 = scalar_lea.vmem %s2894_s7, %s2735_s10 }
  0x12   : > { %347 = vst.msk [vmem:[#allocation2 + $0x28] sm:$0x3] %vm342_vm2, %v1921_v1  ;;  %349 = vst.msk [vmem:[#allocation2 + $0x38] sm:$0x3] %vm342_vm2, %v1921_v1  ;;  %v367_v6 = vld [vmem:[%s1984_s8 + $0x28] sm:$0xff]  ;;  %v364_v7 = vld [vmem:[%s1984_s8 + $0x10] sm:$0xff] }
  0x13   : > { %351 = vst.msk [vmem:[#allocation2 + $0x48] sm:$0x3] %vm342_vm2, %v1921_v1  ;;  %353 = vst.msk [vmem:[#allocation2 + $0x58] sm:$0x3] %vm342_vm2, %v1921_v1  ;;  %v368_v8 = vld [vmem:[%s1984_s8 + $0x30] sm:$0xff]  ;;  %v369_v9 = vld [vmem:[%s1984_s8 + $0x38] sm:$0xff] }
  0x14   : > { %355 = vst.msk [vmem:[#allocation2 + $0x68] sm:$0x3] %vm342_vm2, %v1921_v1  ;;  %357 = vst.msk [vmem:[#allocation2 + $0x78] sm:$0x3] %vm342_vm2, %v1921_v1  ;;  %v2044_v15 = vld [vmem:[%s2888_s1 + $0x9] ss:$0 sm:$0xff] }
  0x15   : > { %359 = vst.msk [vmem:[#allocation2 + $0x88] sm:$0x3] %vm342_vm2, %v1921_v1  ;;  %361 = vst.msk [vmem:[#allocation2 + $0x98] sm:$0x3] %vm342_vm2, %v1921_v1  ;;  %v2049_v16 = vld [vmem:[%s2888_s1 + $0x2] ss:$0 sm:$0xff] }
  0x16   : > { %371 = vst.msk [vmem:[#allocation2 + $0x11] sm:$0xff] %vm340_vm1, %v362_v2  ;;  %372 = vst.msk [vmem:[#allocation2 + $0x21] sm:$0xff] %vm340_vm1, %v363_v3  ;;  %v2054_v17 = vld [vmem:[%s2888_s1 + $0x4] ss:$0 sm:$0xff]  ;;  %v2059_v18 = vld [vmem:[%s2888_s1 + $0x12] ss:$0 sm:$0xff] }
  0x17   : > { %374 = vst.msk [vmem:[#allocation2 + $0x41] sm:$0xff] %vm340_vm1, %v365_v4  ;;  %375 = vst.msk [vmem:[#allocation2 + $0x51] sm:$0xff] %vm340_vm1, %v366_v5  ;;  %v379_v19 = vld [vmem:[#allocation2] sm:$0xff]  ;;  %v2061_v20 = vld [vmem:[#allocation2 + $0x90] sm:$0xff] }
  0x18   : > { %376 = vst.msk [vmem:[#allocation2 + $0x61] sm:$0xff] %vm340_vm1, %v367_v6  ;;  %373 = vst.msk [vmem:[#allocation2 + $0x31] sm:$0xff] %vm340_vm1, %v364_v7  ;;  %v2066_v21 = vld [vmem:[%s2888_s1 + $0x6] ss:$0 sm:$0xff]  ;;  %v2071_v22 = vld [vmem:[%s2888_s1 + $0xa] ss:$0 sm:$0xff]  ;;  %v395_v28 = vmul.f32 %v2024_v12, %v379_v19  ;;  %v2106_v33 = vmul.f32 %v2044_v15, %v379_v19  ;;  %v2109_v34 = vmul.f32 %v2059_v18, %v379_v19 }
  0x19   : > { %377 = vst.msk [vmem:[#allocation2 + $0x71] sm:$0xff] %vm340_vm1, %v368_v8  ;;  %378 = vst.msk [vmem:[#allocation2 + $0x81] sm:$0xff] %vm340_vm1, %v369_v9  ;;  %v2076_v23 = vld [vmem:[%s2888_s1 + $0xb] ss:$0 sm:$0xff]  ;;  %v2081_v24 = vld [vmem:[%s2888_s1 + $0x5] ss:$0 sm:$0xff]  ;;  %v2115_v36 = vmul.f32 %v2066_v21, %v2061_v20 }
  0x1a   : > { %2923 = vst [vmem:[#allocation3_spill] sm:$0xff] %v2044_v15  ;;  %2924 = vst [vmem:[#allocation4_spill] sm:$0xff] %v2059_v18  ;;  %v2086_v25 = vld [vmem:[%s2888_s1 + $0x7] ss:$0 sm:$0xff]  ;;  %v2091_v26 = vld [vmem:[%s2888_s1 + $0x8] ss:$0 sm:$0xff] }
  0x1b   : > { %2925 = vst [vmem:[#allocation5_spill] sm:$0xff] %v2061_v20  ;;  %2926 = vst [vmem:[#allocation6_spill] sm:$0xff] %v2071_v22  ;;  %v2096_v27 = vld [vmem:[%s2888_s1 + $0x13] ss:$0 sm:$0xff]  ;;  %v563_v29 = vld [vmem:[#allocation2 + $0x1] sm:$0xff] }
  0x1c   : > { %2927 = vst [vmem:[#allocation7_spill] sm:$0xff] %v2076_v23  ;;  %2928 = vst [vmem:[#allocation8_spill] sm:$0xff] %v2096_v27  ;;  %v2099_v30 = vld [vmem:[#allocation2 + $0x2] sm:$0xff]  ;;  %v579_v40 = vmul.f32 %v2034_v13, %v563_v29  ;;  %v2125_v41 = vmul.f32 %v2071_v22, %v563_v29  ;;  %v2132_v44 = vmul.f32 %v2096_v27, %v563_v29 }
  0x1d   : > { %v2101_v31 = vld [vmem:[#allocation2 + $0x10] sm:$0xff]  ;;  %v2103_v32 = vld [vmem:[#allocation2 + $0x20] sm:$0xff]  ;;  %2929 = vst [vmem:[#allocation9_spill] sm:$0xff] %v2109_v34  ;;  %v787_v46 = vmul.f32 %v2049_v16, %v2099_v30  ;;  %v2140_v47 = vmul.f32 %v2076_v23, %v2099_v30 }
  0x1e   : > { %v2111_v35 = vld [vmem:[#allocation2 + $0x11] sm:$0xff]  ;;  %v437_v37 = vmul.f32 %v2039_v14, %v2101_v31  ;;  %v503_v38 = vmul.f32 %v2066_v21, %v2103_v32  ;;  %v2121_v39 = vld [vmem:[#allocation2 + $0x21] sm:$0xff]  ;;  %2931 = vst [vmem:[#allocation11_spill] sm:$0xff] %v2125_v41  ;;  %2933 = vst [vmem:[#allocation13_spill] sm:$0xff] %v2132_v44  ;;  %v396_v0 = vmul.f32 %v2024_v12, %v2101_v31 }
  0x1f   : > { %2930 = vst [vmem:[#allocation10_spill] sm:$0xff] %v2111_v35  ;;  %v2127_v42 = vld [vmem:[#allocation2 + $0x12] sm:$0xff]  ;;  %v2129_v43 = vld [vmem:[#allocation2 + $0x22] sm:$0xff]  ;;  %v645_v45 = vmul.f32 %v2054_v17, %v2111_v35  ;;  %2934 = vst [vmem:[#allocation14_spill] sm:$0xff] %v2140_v47  ;;  %v711_v58 = vmul.f32 %v2086_v25, %v2121_v39  ;;  %v438_v9 = vmul.f32 %v2039_v14, %v2103_v32 }
  0x20   : > { %2932 = vst [vmem:[#allocation12_spill] sm:$0xff] %v2127_v42  ;;  %v2142_v48 = vld [vmem:[#allocation2 + $0x40] sm:$0xff]  ;;  %v2144_v49 = vld [vmem:[#allocation2 + $0x50] sm:$0xff]  ;;  %v445_v51 = vadd.f32 %v437_v37, %v395_v28  ;;  %v853_v59 = vmul.f32 %v2081_v24, %v2127_v42  ;;  %v919_v60 = vmul.f32 %v2091_v26, %v2129_v43  ;;  %v646_v20 = vmul.f32 %v2054_v17, %v2121_v39 }
  0x21   : > { %v2146_v50 = vld [vmem:[#allocation2 + $0x60] sm:$0xff]  ;;  %v399_v52 = vmul.f32 %v2024_v12, %v2142_v48  ;;  %v441_v53 = vmul.f32 %v2039_v14, %v2144_v49  ;;  %v2156_v56 = vld [vmem:[#allocation2 + $0x51] sm:$0xff]  ;;  %v788_v18 = vmul.f32 %v2049_v16, %v2127_v42  ;;  %v854_v47 = vmul.f32 %v2081_v24, %v2129_v43 }
  0x22   : > { %v507_v54 = vmul.f32 %v2066_v21, %v2146_v50  ;;  %v2154_v55 = vld [vmem:[#allocation2 + $0x41] sm:$0xff]  ;;  %v2168_v62 = vld [vmem:[#allocation2 + $0x52] sm:$0xff]  ;;  %v511_v1 = vadd.f32 %v503_v38, %v445_v51  ;;  %v649_v4 = vmul.f32 %v2054_v17, %v2156_v56  ;;  %v442_v44 = vmul.f32 %v2039_v14, %v2146_v50 }
  0x23   : > { %v2158_v57 = vld [vmem:[#allocation2 + $0x61] sm:$0xff]  ;;  %v449_v2 = vadd.f32 %v441_v53, %v399_v52  ;;  %v583_v3 = vmul.f32 %v2034_v13, %v2154_v55  ;;  %v2178_v5 = vld [vmem:[#allocation2 + $0x30] sm:$0xff]  ;;  %v857_v37 = vmul.f32 %v2081_v24, %v2168_v62  ;;  %v446_v52 = vadd.f32 %v438_v9, %v396_v0 }
  0x24   : > { %v2166_v61 = vld [vmem:[#allocation2 + $0x42] sm:$0xff]  ;;  %v2180_v6 = vld [vmem:[#allocation2 + $0x31] sm:$0xff]  ;;  %v715_v7 = vmul.f32 %v2086_v25, %v2158_v57  ;;  %v504_v19 = vmul.f32 %v2066_v21, %v2178_v5  ;;  %v587_v28 = vadd.f32 %v579_v40, %v511_v1  ;;  %v580_v53 = vmul.f32 %v2034_v13, %v2111_v35 }
  0x25   : > { %v2170_v63 = vld [vmem:[#allocation2 + $0x62] sm:$0xff]  ;;  %v791_v8 = vmul.f32 %v2049_v16, %v2166_v61  ;;  %v515_v29 = vadd.f32 %v507_v54, %v449_v2  ;;  %v2194_v51 = vld [vmem:[#allocation2 + $0x70] sm:$0xff]  ;;  %v712_v27 = vmul.f32 %v2086_v25, %v2180_v6  ;;  %v400_v2 = vmul.f32 %v2024_v12, %v2144_v49 }
  0x26   : > { %v923_v38 = vmul.f32 %v2091_v26, %v2170_v63  ;;  %v653_v40 = vadd.f32 %v645_v45, %v587_v28  ;;  %v2202_v1 = vld [vmem:[#allocation2 + $0x32] sm:$0xff]  ;;  %v512_v9 = vadd.f32 %v504_v19, %v446_v52  ;;  %v508_v45 = vmul.f32 %v2066_v21, %v2194_v51 }
  0x27   : > { %v591_v54 = vadd.f32 %v583_v3, %v515_v29  ;;  %v2208_v0 = vld [vmem:[#allocation2 + $0x71] sm:$0xff]  ;;  %v450_v29 = vadd.f32 %v442_v44, %v400_v2  ;;  %v584_v34 = vmul.f32 %v2034_v13, %v2156_v56  ;;  %v920_v41 = vmul.f32 %v2091_v26, %v2202_v1 }
  0x28   : > { %v719_v3 = vadd.f32 %v711_v58, %v653_v40  ;;  %v588_v23 = vadd.f32 %v580_v53, %v512_v9  ;;  %v650_v19 = vmul.f32 %v2054_v17, %v2158_v57  ;;  %v716_v52 = vmul.f32 %v2086_v25, %v2208_v0  ;;  %v2224_v35 = vld [vmem:[#allocation2 + $0x72] sm:$0xff]  ;;  %v2239_v9 = vld [vmem:[%s2889_s2] ss:$0 sm:$0xff] }
  0x29   : > { %v657_v28 = vadd.f32 %v649_v4, %v591_v54  ;;  %v516_v15 = vadd.f32 %v508_v45, %v450_v29  ;;  %2935 = vst [vmem:[#allocation15_spill] sm:$0xff] %v2224_v35  ;;  %v397_v44 = vmul.f32 %v2024_v12, %v2103_v32  ;;  %v792_v4 = vmul.f32 %v2049_v16, %v2168_v62 }
  0x2a   : > { %v795_v42 = vadd.f32 %v787_v46, %v719_v3  ;;  %v654_v58 = vadd.f32 %v646_v20, %v588_v23  ;;  %v439_v53 = vmul.f32 %v2039_v14, %v2178_v5  ;;  %v505_v40 = vmul.f32 %v2066_v21, %v2142_v48 }
  0x2b   : > { %v723_v22 = vadd.f32 %v715_v7, %v657_v28  ;;  %v592_v46 = vadd.f32 %v584_v34, %v516_v15  ;;  %v858_v7 = vmul.f32 %v2081_v24, %v2170_v63  ;;  %v924_v23 = vmul.f32 %v2091_v26, %v2224_v35 }
  0x2c   : > { %v861_v54 = vadd.f32 %v853_v59, %v795_v42  ;;  %v720_v20 = vadd.f32 %v712_v27, %v654_v58  ;;  %v447_v45 = vadd.f32 %v439_v53, %v397_v44  ;;  %v581_v3 = vmul.f32 %v2034_v13, %v2121_v39 }
  0x2d   : > { %v799_v2 = vadd.f32 %v791_v8, %v723_v22  ;;  %v658_v22 = vadd.f32 %v650_v19, %v592_v46  ;;  %v647_v15 = vmul.f32 %v2054_v17, %v2180_v6  ;;  %v713_v8 = vmul.f32 %v2086_v25, %v2154_v55 }
  0x2e   : > { %v927_v28 = vadd.f32 %v919_v60, %v861_v54  ;;  %v796_v34 = vadd.f32 %v788_v18, %v720_v20  ;;  %v513_v59 = vadd.f32 %v505_v40, %v447_v45  ;;  %v398_v27 = vmul.f32 %v2024_v12, %v2178_v5 }
  0x2f   : > { %v865_v42 = vadd.f32 %v857_v37, %v799_v2  ;;  %v724_v58 = vadd.f32 %v716_v52, %v658_v22  ;;  %v440_v60 = vmul.f32 %v2039_v14, %v2142_v48  ;;  %v506_v53 = vmul.f32 %v2066_v21, %v2144_v49  ;;  %v2266_v22 = vld [vmem:[#allocation2 + $0x80] sm:$0xff] }
  0x30   : > { %v985_v29 = vadd.f32 %v2239_v9, %v927_v28  ;;  %v862_v37 = vadd.f32 %v854_v47, %v796_v34  ;;  %v589_v19 = vadd.f32 %v581_v3, %v513_v59  ;;  %v582_v18 = vmul.f32 %v2034_v13, %v2180_v6  ;;  %2936 = vst [vmem:[#allocation16_spill] sm:$0xff] %v2266_v22  ;;  %v2276_v59 = vld [vmem:[%s2888_s1 + $0x14] ss:$0 sm:$0xff] }
  0x31   : > { %v931_v44 = vadd.f32 %v923_v38, %v865_v42  ;;  %v800_v2 = vadd.f32 %v792_v4, %v724_v58  ;;  %v448_v46 = vadd.f32 %v440_v60, %v398_v27  ;;  %v789_v38 = vmul.f32 %v2049_v16, %v2129_v43 }
  0x32   : > { %v993_v40 = vmax.f32 %v985_v29, 0.0  ;;  %v928_v20 = vadd.f32 %v920_v41, %v862_v37  ;;  %v655_v45 = vadd.f32 %v647_v15, %v589_v19  ;;  %v855_v47 = vmul.f32 %v2081_v24, %v2202_v1 }
  0x33   : > { %v989_v54 = vadd.f32 %v2239_v9, %v931_v44  ;;  %v866_v3 = vadd.f32 %v858_v7, %v800_v2  ;;  %v514_v28 = vadd.f32 %v506_v53, %v448_v46  ;;  %v648_v42 = vmul.f32 %v2054_v17, %v2154_v55 }
  0x34   : > { %1861 = vmatprep.mubr.msk.f32.mxu0 %vm340_vm1, %v993_v40  ;;  %v986_v4 = vadd.f32 %v2239_v9, %v928_v20  ;;  %v721_v41 = vadd.f32 %v713_v8, %v655_v45  ;;  %v921_v15 = vmul.f32 %v2091_v26, %v2166_v61  ;;  %v714_v34 = vmul.f32 %v2086_v25, %v2156_v56 }
  0x35   : > { %v997_v52 = vmax.f32 %v989_v54, 0.0  ;;  %v932_v7 = vadd.f32 %v924_v23, %v866_v3  ;;  %v590_v27 = vadd.f32 %v582_v18, %v514_v28  ;;  %v401_v29 = vmul.f32 %v2024_v12, %v2146_v50  ;;  %v2288_v23 = vld [vmem:[#allocation2 + $0x81] sm:$0xff] }
  0x36   : > { %v443_v8 = vmul.f32 %v2039_v14, %v2194_v51  ;;  %v994_v44 = vmax.f32 %v986_v4, 0.0  ;;  %v797_v58 = vadd.f32 %v789_v38, %v721_v41  ;;  %v790_v60 = vmul.f32 %v2049_v16, %v2202_v1  ;;  %2937 = vst [vmem:[#allocation17_spill] sm:$0xff] %v2288_v23  ;;  %v2303_v3 = vld [vmem:[#allocation2 + $0x82] sm:$0xff]  ;;  %v2316_v4 = vld [vmem:[%s2888_s1 + $0xc] ss:$0 sm:$0xff] }
  0x37   : > { %1867 = vmatprep.mubr.msk.f32.mxu1 %vm340_vm1, %v997_v52  ;;  %v509_v37 = vmul.f32 %v2066_v21, %v2266_v22  ;;  %v990_v19 = vadd.f32 %v2239_v9, %v932_v7  ;;  %v656_v53 = vadd.f32 %v648_v42, %v590_v27  ;;  %v585_v18 = vmul.f32 %v2034_v13, %v2158_v57  ;;  %v2323_v7 = vld [vmem:[#allocation2 + $0x91] sm:$0xff] }
  0x38   : > { %v451_v40 = vadd.f32 %v443_v8, %v401_v29  ;;  %v2294_v54 = vmul.f32 %v2276_v59, %v2099_v30  ;;  %1862 = vmatmul.mubr.msk.f32.vlgmr.msra.gmra.mxu0 %vm340_vm1, %v994_v44  ;;  %v863_v2 = vadd.f32 %v855_v47, %v797_v58  ;;  %v856_v46 = vmul.f32 %v2081_v24, %v2166_v61 }
  0x39   : > { %v922_v21 = vmul.f32 %v2091_v26, %v2168_v62  ;;  %v998_v20 = vmax.f32 %v990_v19, 0.0  ;;  %v722_v45 = vadd.f32 %v714_v34, %v656_v53  ;;  %v651_v52 = vmul.f32 %v2054_v17, %v2208_v0  ;;  %2938 = vst [vmem:[#allocation18_spill] sm:$0xff] %v2303_v3  ;;  %1888 = vmatpush3.msk.msra.mxu0 %vm1075_vm0, %v2019_v11 }
  0x3a   : > { %v517_v38 = vadd.f32 %v509_v37, %v451_v40  ;;  %v929_v30 = vadd.f32 %v921_v15, %v863_v2  ;;  %v717_v47 = vmul.f32 %v2086_v25, %v2288_v23  ;;  %v402_v28 = vmul.f32 %v2024_v12, %v2194_v51  ;;  %2939 = vst [vmem:[#allocation19_spill] sm:$0xff] %v2323_v7  ;;  %v2328_v12 = vld [vmem:[%s2888_s1 + $0xf] ss:$0 sm:$0xff]  ;;  %v2342_v37 = vld [vmem:[%s2888_s1 + $0xd] ss:$0 sm:$0xff] }
  0x3b   : > { %v444_v42 = vmul.f32 %v2039_v14, %v2266_v22  ;;  %1868 = vmatmul.mubr.msk.f32.vlgmr.msra.gmra.mxu1 %vm340_vm1, %v998_v20  ;;  %v798_v41 = vadd.f32 %v790_v60, %v722_v45  ;;  %v793_v11 = vmul.f32 %v2049_v16, %v2170_v63  ;;  %v859_v15 = vmul.f32 %v2081_v24, %v2224_v35  ;;  %v2940_v45 = vld [vmem:[#allocation10_spill] sm:$0xff] }
  0x3c   : > { %v593_v34 = vadd.f32 %v585_v18, %v517_v38  ;;  %v987_v14 = vadd.f32 %v2239_v9, %v929_v30  ;;  %v925_v27 = vmul.f32 %v2091_v26, %v2303_v3  ;;  %v586_v8 = vmul.f32 %v2034_v13, %v2208_v0  ;;  %1874 = vmatpush3.msk.msra.mxu1 %vm1075_vm0, %v2014_v10  ;;  %v2941_v38 = vld [vmem:[#allocation3_spill] sm:$0xff] }
  0x3d   : > { %v452_v29 = vadd.f32 %v444_v42, %v402_v28  ;;  %v864_v44 = vadd.f32 %v856_v46, %v798_v41  ;;  %v652_v60 = vmul.f32 %v2054_v17, %v2288_v23  ;;  %v459_v19 = vmul.f32 %v2316_v4, %v2101_v31  ;;  %v2356_v46 = vld [vmem:[%s2888_s1 + $0x10] ss:$0 sm:$0xff] }
  0x3e   : > { %v659_v58 = vadd.f32 %v651_v52, %v593_v34  ;;  %v995_v53 = vmax.f32 %v987_v14, 0.0  ;;  %v718_v13 = vmul.f32 %v2086_v25, %v2323_v7  ;;  %v525_v10 = vmul.f32 %v2328_v12, %v2103_v32  ;;  %v2943_v14 = vld [vmem:[#allocation6_spill] sm:$0xff] }
  0x3f   : > { %v518_v40 = vadd.f32 %v2115_v36, %v452_v29  ;;  %v930_v18 = vadd.f32 %v922_v21, %v864_v44  ;;  %v794_v17 = vmul.f32 %v2049_v16, %v2224_v35  ;;  %v467_v20 = vadd.f32 %v459_v19, %v2106_v33  ;;  %v2372_v33 = vld [vmem:[%s2888_s1 + $0xe] ss:$0 sm:$0xff] }
  0x40   : > { %v725_v2 = vadd.f32 %v717_v47, %v659_v58  ;;  %1864 = vmatprep.mubr.msk.f32.mxu0 %vm340_vm1, %v995_v53  ;;  %v860_v25 = vmul.f32 %v2081_v24, %v2303_v3  ;;  %v667_v21 = vmul.f32 %v2342_v37, %v2940_v45  ;;  %v410_v52 = vmul.f32 %v2941_v38, %v2101_v31  ;;  %v2367_v47 = vld [vmem:[#allocation2 + $0x92] sm:$0xff]  ;;  %v2377_v24 = vld [vmem:[%s2888_s1 + $0x11] ss:$0 sm:$0xff]  ;;  %v2944_v58 = vld [vmem:[#allocation11_spill] sm:$0xff] }
  0x41   : > { %v594_v36 = vadd.f32 %v586_v8, %v518_v40  ;;  %v988_v16 = vadd.f32 %v2239_v9, %v930_v18  ;;  %2942 = vst [vmem:[#allocation10_spill] sm:$0xff] %v2367_v47  ;;  %v533_v28 = vadd.f32 %v525_v10, %v467_v20  ;;  %v460_v42 = vmul.f32 %v2316_v4, %v2103_v32  ;;  %v2391_v40 = vld [vmem:[%s2888_s1 + $0x15] ss:$0 sm:$0xff]  ;;  %v2437_v3 = vld [vmem:[%s2888_s1 + $0x17] ss:$0 sm:$0xff] }
  0x42   : > { %v801_v30 = vadd.f32 %v793_v11, %v725_v2  ;;  %v733_v34 = vmul.f32 %v2356_v46, %v2121_v39  ;;  %v526_v11 = vmul.f32 %v2328_v12, %v2178_v5  ;;  %v602_v29 = vmul.f32 %v2943_v14, %v2940_v45  ;;  %v2945_v2 = vld [vmem:[#allocation12_spill] sm:$0xff] }
  0x43   : > { %v660_v41 = vadd.f32 %v652_v60, %v594_v36  ;;  %v996_v8 = vmax.f32 %v988_v16, 0.0  ;;  %v609_v19 = vadd.f32 %v2944_v58, %v533_v28  ;;  %v468_v53 = vadd.f32 %v460_v42, %v410_v52  ;;  %v2396_v60 = vld [vmem:[%s2888_s1 + $0x18] ss:$0 sm:$0xff] }
  0x44   : > { %v867_v44 = vadd.f32 %v859_v15, %v801_v30  ;;  %v926_v18 = vmul.f32 %v2091_v26, %v2367_v47  ;;  %v875_v15 = vmul.f32 %v2372_v33, %v2945_v2  ;;  %v941_v20 = vmul.f32 %v2377_v24, %v2129_v43 }
  0x45   : > { %v726_v10 = vadd.f32 %v718_v13, %v660_v41  ;;  %1865 = vmatmul.mubr.msk.f32.gmra.mxu0 %vm340_vm1, %v996_v8  ;;  %v675_v52 = vadd.f32 %v667_v21, %v609_v19  ;;  %v534_v16 = vadd.f32 %v526_v11, %v468_v53  ;;  %v668_v30 = vmul.f32 %v2342_v37, %v2121_v39  ;;  %v2410_v13 = vld [vmem:[%s2888_s1 + $0x16] ss:$0 sm:$0xff]  ;;  %v2946_v8 = vld [vmem:[#allocation7_spill] sm:$0xff]  ;;  %v2426_v19 = vld [vmem:[%s2888_s1 + $0x19] ss:$0 sm:$0xff] }
  0x46   : > { %v933_v36 = vadd.f32 %v925_v27, %v867_v44  ;;  %v734_v28 = vmul.f32 %v2356_v46, %v2180_v6  ;;  %v481_v42 = vmul.f32 %v2391_v40, %v2101_v31  ;;  %v547_v27 = vmul.f32 %v2396_v60, %v2103_v32  ;;  %v2947_v53 = vld [vmem:[#allocation9_spill] sm:$0xff] }
  0x47   : > { %v802_v26 = vadd.f32 %v794_v17, %v726_v10  ;;  %v741_v41 = vadd.f32 %v733_v34, %v675_v52  ;;  %v610_v11 = vadd.f32 %v602_v29, %v534_v16  ;;  %v810_v44 = vmul.f32 %v2946_v8, %v2945_v2  ;;  %v2948_v34 = vld [vmem:[#allocation14_spill] sm:$0xff]  ;;  %v2949_v16 = vld [vmem:[#allocation4_spill] sm:$0xff] }
  0x48   : > { %v991_v21 = vadd.f32 %v2239_v9, %v933_v36  ;;  %v876_v17 = vmul.f32 %v2372_v33, %v2129_v43  ;;  %v489_v10 = vadd.f32 %v481_v42, %v2947_v53  ;;  %v689_v47 = vmul.f32 %v2410_v13, %v2940_v45  ;;  %v2442_v42 = vld [vmem:[%s2888_s1 + $0x1a] ss:$0 sm:$0xff] }
  0x49   : > { %v868_v58 = vadd.f32 %v860_v25, %v802_v26  ;;  %v817_v29 = vadd.f32 %v2948_v34, %v741_v41  ;;  %v676_v52 = vadd.f32 %v668_v30, %v610_v11  ;;  %v424_v25 = vmul.f32 %v2949_v16, %v2101_v31 }
  0x4a   : > { %v999_v36 = vmax.f32 %v991_v21, 0.0  ;;  %v555_v53 = vadd.f32 %v547_v27, %v489_v10  ;;  %v482_v21 = vmul.f32 %v2391_v40, %v2103_v32  ;;  %v548_v30 = vmul.f32 %v2396_v60, %v2178_v5  ;;  %v2457_v27 = vld [vmem:[%s2889_s2 + $0x1] ss:$0 sm:$0xff]  ;;  %v2950_v10 = vld [vmem:[#allocation13_spill] sm:$0xff] }
  0x4b   : > { %v934_v26 = vadd.f32 %v926_v18, %v868_v58  ;;  %v883_v31 = vadd.f32 %v875_v15, %v817_v29  ;;  %v742_v18 = vadd.f32 %v734_v28, %v676_v52  ;;  %v942_v41 = vmul.f32 %v2377_v24, %v2202_v1 }
  0x4c   : > { %1870 = vmatprep.mubr.msk.f32.mxu1 %vm340_vm1, %v999_v36  ;;  %v755_v11 = vmul.f32 %v2426_v19, %v2121_v39  ;;  %v631_v34 = vadd.f32 %v2950_v10, %v555_v53  ;;  %v490_v7 = vadd.f32 %v482_v21, %v424_v25  ;;  %v2951_v36 = vld [vmem:[#allocation8_spill] sm:$0xff]  ;;  %v897_v52 = vmul.f32 %v2437_v3, %v2945_v2 }
  0x4d   : > { %v992_v58 = vadd.f32 %v2239_v9, %v934_v26  ;;  %v624_v15 = vmul.f32 %v2951_v36, %v2940_v45  ;;  %v949_v28 = vadd.f32 %v941_v20, %v883_v31  ;;  %v818_v29 = vadd.f32 %v810_v44, %v742_v18 }
  0x4e   : > { %v963_v23 = vmul.f32 %v2442_v42, %v2129_v43  ;;  %v697_v26 = vadd.f32 %v689_v47, %v631_v34  ;;  %v556_v22 = vadd.f32 %v548_v30, %v490_v7  ;;  %v690_v35 = vmul.f32 %v2410_v13, %v2121_v39 }
  0x4f   : > { %v1000_v9 = vmax.f32 %v992_v58, 0.0  ;;  %v1007_v53 = vadd.f32 %v2457_v27, %v949_v28  ;;  %v884_v25 = vadd.f32 %v876_v17, %v818_v29  ;;  %v411_v45 = vmul.f32 %v2941_v38, %v2103_v32 }
  0x50   : > { %v461_v20 = vmul.f32 %v2316_v4, %v2178_v5  ;;  %v763_v44 = vadd.f32 %v755_v11, %v697_v26  ;;  %v632_v21 = vadd.f32 %v624_v15, %v556_v22  ;;  %v756_v47 = vmul.f32 %v2426_v19, %v2180_v6  ;;  %v2498_v26 = vld [vmem:[%s2889_s2 + $0x2] ss:$0 sm:$0xff] }
  0x51   : > { %1871 = vmatmul.mubr.msk.f32.gmra.mxu1 %vm340_vm1, %v1000_v9  ;;  %v527_v7 = vmul.f32 %v2328_v12, %v2142_v48  ;;  %v1015_v30 = vmax.f32 %v1007_v53, 0.0  ;;  %v950_v31 = vadd.f32 %v942_v41, %v884_v25  ;;  %v603_v17 = vmul.f32 %v2943_v14, %v2121_v39 }
  0x52   : > { %v469_v18 = vadd.f32 %v461_v20, %v411_v45  ;;  %v839_v58 = vadd.f32 %v2294_v54, %v763_v44  ;;  %v698_v10 = vadd.f32 %v690_v35, %v632_v21  ;;  %v832_v34 = vmul.f32 %v2276_v59, %v2945_v2 }
  0x53   : > { %v898_v22 = vmul.f32 %v2437_v3, %v2129_v43  ;;  %1875 = vmatprep.mubr.msk.f32.mxu1 %vm340_vm1, %v1015_v30  ;;  %v1008_v11 = vadd.f32 %v2457_v27, %v950_v31  ;;  %v964_v41 = vmul.f32 %v2442_v42, %v2202_v1  ;;  %v669_v28 = vmul.f32 %v2342_v37, %v2180_v6  ;;  %v2952_v31 = vld [vmem:[#allocation5_spill] sm:$0xff] }
  0x54   : > { %v535_v15 = vadd.f32 %v527_v7, %v469_v18  ;;  %v905_v29 = vadd.f32 %v897_v52, %v839_v58  ;;  %v764_v54 = vadd.f32 %v756_v47, %v698_v10  ;;  %v412_v35 = vmul.f32 %v2941_v38, %v2178_v5 }
  0x55   : > { %v462_v2 = vmul.f32 %v2316_v4, %v2142_v48  ;;  %v1016_v9 = vmax.f32 %v1008_v11, 0.0  ;;  %v735_v25 = vmul.f32 %v2356_v46, %v2154_v55  ;;  %v528_v52 = vmul.f32 %v2328_v12, %v2144_v49 }
  0x56   : > { %v611_v53 = vadd.f32 %v603_v17, %v535_v15  ;;  %v971_v45 = vadd.f32 %v963_v23, %v905_v29  ;;  %v840_v20 = vadd.f32 %v832_v34, %v764_v54  ;;  %v604_v21 = vmul.f32 %v2943_v14, %v2180_v6 }
  0x57   : > { %v470_v44 = vadd.f32 %v462_v2, %v412_v35  ;;  %1876 = vmatmul.mubr.msk.f32.vlgmr.msra.gmra.mxu1 %vm340_vm1, %v1016_v9  ;;  %v811_v7 = vmul.f32 %v2946_v8, %v2129_v43  ;;  %v877_v30 = vmul.f32 %v2372_v33, %v2202_v1  ;;  %v2513_v18 = vmul.f32 %v2328_v12, %v2952_v31 }
  0x58   : > { %v677_v47 = vadd.f32 %v669_v28, %v611_v53  ;;  %v1029_v23 = vadd.f32 %v2498_v26, %v971_v45  ;;  %v906_v17 = vadd.f32 %v898_v22, %v840_v20  ;;  %v670_v10 = vmul.f32 %v2342_v37, %v2154_v55 }
  0x59   : > { %v536_v58 = vadd.f32 %v528_v52, %v470_v44  ;;  %v425_v11 = vmul.f32 %v2949_v16, %v2103_v32  ;;  %v483_v15 = vmul.f32 %v2391_v40, %v2178_v5  ;;  %v549_v28 = vmul.f32 %v2396_v60, %v2142_v48 }
  0x5a   : > { %v743_v34 = vadd.f32 %v735_v25, %v677_v47  ;;  %v1037_v29 = vmax.f32 %v1029_v23, 0.0  ;;  %v972_v54 = vadd.f32 %v964_v41, %v906_v17  ;;  %v736_v22 = vmul.f32 %v2356_v46, %v2156_v56 }
  0x5b   : > { %v612_v35 = vadd.f32 %v604_v21, %v536_v58  ;;  %v943_v9 = vmul.f32 %v2377_v24, %v2166_v61  ;;  %v491_v53 = vadd.f32 %v483_v15, %v425_v11  ;;  %v625_v32 = vmul.f32 %v2951_v36, %v2121_v39 }
  0x5c   : > { %v819_v2 = vadd.f32 %v811_v7, %v743_v34  ;;  %1889 = vmatprep.mubr.msk.f32.mxu0 %vm340_vm1, %v1037_v29  ;;  %v1030_v25 = vadd.f32 %v2498_v26, %v972_v54  ;;  %v812_v41 = vmul.f32 %v2946_v8, %v2202_v1  ;;  %v878_v45 = vmul.f32 %v2372_v33, %v2166_v61 }
  0x5d   : > { %v678_v52 = vadd.f32 %v670_v10, %v612_v35  ;;  %v557_v44 = vadd.f32 %v549_v28, %v491_v53  ;;  %v691_v21 = vmul.f32 %v2410_v13, %v2180_v6  ;;  %v426_v47 = vmul.f32 %v2949_v16, %v2178_v5 }
  0x5e   : > { %v885_v20 = vadd.f32 %v877_v30, %v819_v2  ;;  %v1038_v39 = vmax.f32 %v1030_v25, 0.0  ;;  %v484_v23 = vmul.f32 %v2391_v40, %v2142_v48  ;;  %v550_v17 = vmul.f32 %v2396_v60, %v2144_v49 }
  0x5f   : > { %v744_v7 = vadd.f32 %v736_v22, %v678_v52  ;;  %v944_v10 = vmul.f32 %v2377_v24, %v2168_v62  ;;  %v633_v30 = vadd.f32 %v625_v32, %v557_v44  ;;  %v757_v34 = vmul.f32 %v2426_v19, %v2154_v55 }
  0x60   : > { %v951_v58 = vadd.f32 %v943_v9, %v885_v20  ;;  %1890 = vmatmul.mubr.msk.f32.vlgmr.msra.gmra.mxu0 %vm340_vm1, %v1038_v39  ;;  %v833_v5 = vmul.f32 %v2276_v59, %v2129_v43  ;;  %v492_v15 = vadd.f32 %v484_v23, %v426_v47  ;;  %v626_v28 = vmul.f32 %v2951_v36, %v2180_v6 }
  0x61   : > { %v820_v11 = vadd.f32 %v812_v41, %v744_v7  ;;  %v699_v54 = vadd.f32 %v691_v21, %v633_v30  ;;  %v899_v35 = vmul.f32 %v2437_v3, %v2202_v1  ;;  %v692_v22 = vmul.f32 %v2410_v13, %v2154_v55 }
  0x62   : > { %v1009_v29 = vadd.f32 %v2457_v27, %v951_v58  ;;  %v558_v9 = vadd.f32 %v550_v17, %v492_v15  ;;  %v413_v53 = vmul.f32 %v2941_v38, %v2142_v48  ;;  %v463_v43 = vmul.f32 %v2316_v4, %v2144_v49 }
  0x63   : > { %v886_v2 = vadd.f32 %v878_v45, %v820_v11  ;;  %v765_v25 = vadd.f32 %v757_v34, %v699_v54  ;;  %v758_v6 = vmul.f32 %v2426_v19, %v2156_v56  ;;  %v529_v52 = vmul.f32 %v2328_v12, %v2146_v50 }
  0x64   : > { %v1017_v32 = vmax.f32 %v1009_v29, 0.0  ;;  %v634_v20 = vadd.f32 %v626_v28, %v558_v9  ;;  %v471_v44 = vadd.f32 %v463_v43, %v413_v53  ;;  %v605_v45 = vmul.f32 %v2943_v14, %v2154_v55 }
  0x65   : > { %v952_v41 = vadd.f32 %v944_v10, %v886_v2  ;;  %v841_v21 = vadd.f32 %v833_v5, %v765_v25  ;;  %v965_v47 = vmul.f32 %v2442_v42, %v2166_v61  ;;  %v834_v39 = vmul.f32 %v2276_v59, %v2202_v1 }
  0x66   : > { %1878 = vmatprep.mubr.msk.f32.mxu1 %vm340_vm1, %v1017_v32  ;;  %v900_v7 = vmul.f32 %v2437_v3, %v2166_v61  ;;  %v700_v17 = vadd.f32 %v692_v22, %v634_v20  ;;  %v537_v58 = vadd.f32 %v529_v52, %v471_v44  ;;  %v671_v10 = vmul.f32 %v2342_v37, %v2156_v56 }
  0x67   : > { %v1010_v23 = vadd.f32 %v2457_v27, %v952_v41  ;;  %v907_v30 = vadd.f32 %v899_v35, %v841_v21  ;;  %v414_v34 = vmul.f32 %v2941_v38, %v2144_v49  ;;  %v464_v11 = vmul.f32 %v2316_v4, %v2146_v50 }
  0x68   : > { %v530_v1 = vmul.f32 %v2328_v12, %v2194_v51  ;;  %v766_v15 = vadd.f32 %v758_v6, %v700_v17  ;;  %v613_v28 = vadd.f32 %v605_v45, %v537_v58  ;;  %v737_v29 = vmul.f32 %v2356_v46, %v2158_v57 }
  0x69   : > { %v1018_v5 = vmax.f32 %v1010_v23, 0.0  ;;  %v973_v54 = vadd.f32 %v965_v47, %v907_v30  ;;  %v966_v22 = vmul.f32 %v2442_v42, %v2168_v62  ;;  %v472_v35 = vadd.f32 %v464_v11, %v414_v34 }
  0x6a   : > { %v606_v2 = vmul.f32 %v2943_v14, %v2156_v56  ;;  %v842_v9 = vadd.f32 %v834_v39, %v766_v15  ;;  %v679_v53 = vadd.f32 %v671_v10, %v613_v28  ;;  %v813_v43 = vmul.f32 %v2946_v8, %v2166_v61 }
  0x6b   : > { %1879 = vmatmul.mubr.msk.f32.gmra.mxu1 %vm340_vm1, %v1018_v5  ;;  %v879_v32 = vmul.f32 %v2372_v33, %v2168_v62  ;;  %v1031_v25 = vadd.f32 %v2498_v26, %v973_v54  ;;  %v538_v6 = vadd.f32 %v530_v1, %v472_v35  ;;  %v672_v52 = vmul.f32 %v2342_v37, %v2158_v57  ;;  %v2953_v54 = vld [vmem:[#allocation15_spill] sm:$0xff] }
  0x6c   : > { %v427_v41 = vmul.f32 %v2949_v16, %v2142_v48  ;;  %v908_v20 = vadd.f32 %v900_v7, %v842_v9  ;;  %v745_v44 = vadd.f32 %v737_v29, %v679_v53  ;;  %v485_v45 = vmul.f32 %v2391_v40, %v2144_v49 }
  0x6d   : > { %v551_v21 = vmul.f32 %v2396_v60, %v2146_v50  ;;  %v1039_v47 = vmax.f32 %v1031_v25, 0.0  ;;  %v945_v39 = vmul.f32 %v2377_v24, %v2170_v63  ;;  %v614_v23 = vadd.f32 %v606_v2, %v538_v6 }
  0x6e   : > { %v738_v17 = vmul.f32 %v2356_v46, %v2208_v0  ;;  %v974_v58 = vadd.f32 %v966_v22, %v908_v20  ;;  %v821_v10 = vadd.f32 %v813_v43, %v745_v44  ;;  %v493_v30 = vadd.f32 %v485_v45, %v427_v41 }
  0x6f   : > { %v627_v48 = vmul.f32 %v2951_v36, %v2154_v55  ;;  %1892 = vmatprep.mubr.msk.f32.mxu0 %vm340_vm1, %v1039_v47  ;;  %v680_v7 = vadd.f32 %v672_v52, %v614_v23  ;;  %v814_v34 = vmul.f32 %v2946_v8, %v2168_v62  ;;  %v880_v11 = vmul.f32 %v2372_v33, %v2170_v63 }
  0x70   : > { %v693_v1 = vmul.f32 %v2410_v13, %v2156_v56  ;;  %v1032_v5 = vadd.f32 %v2498_v26, %v974_v58  ;;  %v887_v15 = vadd.f32 %v879_v32, %v821_v10  ;;  %v559_v28 = vadd.f32 %v551_v21, %v493_v30  ;;  %v2954_v58 = vld [vmem:[#allocation16_spill] sm:$0xff] }
  0x71   : > { %v428_v29 = vmul.f32 %v2949_v16, %v2144_v49  ;;  %v746_v55 = vadd.f32 %v738_v17, %v680_v7  ;;  %v946_v22 = vmul.f32 %v2377_v24, %v2953_v54  ;;  %v486_v35 = vmul.f32 %v2391_v40, %v2146_v50 }
  0x72   : > { %v552_v2 = vmul.f32 %v2396_v60, %v2194_v51  ;;  %v1040_v9 = vmax.f32 %v1032_v5, 0.0  ;;  %v953_v53 = vadd.f32 %v945_v39, %v887_v15  ;;  %v635_v43 = vadd.f32 %v627_v48, %v559_v28 }
  0x73   : > { %v759_v32 = vmul.f32 %v2426_v19, %v2158_v57  ;;  %v822_v25 = vadd.f32 %v814_v34, %v746_v55  ;;  %v835_v49 = vmul.f32 %v2276_v59, %v2166_v61  ;;  %v494_v6 = vadd.f32 %v486_v35, %v428_v29 }
  0x74   : > { %v628_v52 = vmul.f32 %v2951_v36, %v2156_v56  ;;  %1893 = vmatmul.mubr.msk.f32.gmra.mxu0 %vm340_vm1, %v1040_v9  ;;  %v1011_v41 = vadd.f32 %v2457_v27, %v953_v53  ;;  %v701_v20 = vadd.f32 %v693_v1, %v635_v43  ;;  %v901_v44 = vmul.f32 %v2437_v3, %v2168_v62 }
  0x75   : > { %v694_v45 = vmul.f32 %v2410_v13, %v2158_v57  ;;  %v888_v21 = vadd.f32 %v880_v11, %v822_v25  ;;  %v560_v47 = vadd.f32 %v552_v2, %v494_v6  ;;  %v415_v61 = vmul.f32 %v2941_v38, %v2146_v50 }
  0x76   : > { %v465_v39 = vmul.f32 %v2316_v4, %v2194_v51  ;;  %v1019_v56 = vmax.f32 %v1011_v41, 0.0  ;;  %v767_v23 = vadd.f32 %v759_v32, %v701_v20  ;;  %v760_v17 = vmul.f32 %v2426_v19, %v2208_v0  ;;  %v2955_v32 = vld [vmem:[#allocation17_spill] sm:$0xff] }
  0x77   : > { %v531_v10 = vmul.f32 %v2328_v12, %v2954_v58  ;;  %v954_v30 = vadd.f32 %v946_v22, %v888_v21  ;;  %v636_v48 = vadd.f32 %v628_v52, %v560_v47  ;;  %v607_v34 = vmul.f32 %v2943_v14, %v2158_v57 }
  0x78   : > { %v473_v7 = vadd.f32 %v465_v39, %v415_v61  ;;  %1881 = vmatprep.mubr.msk.f32.mxu1 %vm340_vm1, %v1019_v56  ;;  %v843_v11 = vadd.f32 %v835_v49, %v767_v23  ;;  %v967_v1 = vmul.f32 %v2442_v42, %v2170_v63  ;;  %v836_v5 = vmul.f32 %v2276_v59, %v2168_v62  ;;  %v2956_v56 = vld [vmem:[#allocation19_spill] sm:$0xff] }
  0x79   : > { %v902_v15 = vmul.f32 %v2437_v3, %v2170_v63  ;;  %v1012_v12 = vadd.f32 %v2457_v27, %v954_v30  ;;  %v702_v28 = vadd.f32 %v694_v45, %v636_v48  ;;  %v673_v55 = vmul.f32 %v2342_v37, %v2208_v0 }
  0x7a   : > { %v539_v29 = vadd.f32 %v531_v10, %v473_v7  ;;  %v909_v22 = vadd.f32 %v901_v44, %v843_v11  ;;  %v968_v35 = vmul.f32 %v2442_v42, %v2953_v54  ;;  %v416_v2 = vmul.f32 %v2941_v38, %v2194_v51 }
  0x7b   : > { %v466_v62 = vmul.f32 %v2316_v4, %v2954_v58  ;;  %v1020_v9 = vmax.f32 %v1012_v12, 0.0  ;;  %v768_v53 = vadd.f32 %v760_v17, %v702_v28  ;;  %v739_v25 = vmul.f32 %v2356_v46, %v2955_v32 }
  0x7c   : > { %v615_v43 = vadd.f32 %v607_v34, %v539_v29  ;;  %v975_v49 = vadd.f32 %v967_v1, %v909_v22  ;;  %v815_v6 = vmul.f32 %v2946_v8, %v2170_v63  ;;  %v608_v41 = vmul.f32 %v2943_v14, %v2208_v0 }
  0x7d   : > { %v474_v52 = vadd.f32 %v466_v62, %v416_v2  ;;  %1882 = vmatmul.mubr.msk.f32.gmra.mxu1 %vm340_vm1, %v1020_v9  ;;  %v844_v38 = vadd.f32 %v836_v5, %v768_v53  ;;  %v881_v4 = vmul.f32 %v2372_v33, %v2953_v54  ;;  %v674_v44 = vmul.f32 %v2342_v37, %v2955_v32 }
  0x7e   : > { %v681_v20 = vadd.f32 %v673_v55, %v615_v43  ;;  %v1033_v45 = vadd.f32 %v2498_v26, %v975_v49  ;;  %v429_v47 = vmul.f32 %v2949_v16, %v2146_v50  ;;  %v487_v14 = vmul.f32 %v2391_v40, %v2194_v51  ;;  %v2957_v50 = vld [vmem:[#allocation18_spill] sm:$0xff] }
  0x7f   : > { %v540_v21 = vadd.f32 %v2513_v18, %v474_v52  ;;  %v910_v61 = vadd.f32 %v902_v15, %v844_v38  ;;  %v740_v23 = vmul.f32 %v2356_v46, %v2956_v56  ;;  %v553_v17 = vmul.f32 %v2396_v60, %v2954_v58  ;;  %v2958_v43 = vld [vmem:[#allocation10_spill] sm:$0xff] }
  0x80   : > { %v747_v39 = vadd.f32 %v739_v25, %v681_v20  ;;  %v1041_v10 = vmax.f32 %v1033_v45, 0.0  ;;  %v495_v30 = vadd.f32 %v487_v14, %v429_v47  ;;  %v629_v18 = vmul.f32 %v2951_v36, %v2158_v57 }
  0x81   : > { %v616_v37 = vadd.f32 %v608_v41, %v540_v21  ;;  %v976_v48 = vadd.f32 %v968_v35, %v910_v61  ;;  %v947_v34 = vmul.f32 %v2377_v24, %v2957_v50  ;;  %v816_v11 = vmul.f32 %v2946_v8, %v2953_v54 }
  0x82   : > { %v823_v7 = vadd.f32 %v815_v6, %v747_v39  ;;  %1895 = vmatprep.mubr.msk.f32.mxu0 %vm340_vm1, %v1041_v10  ;;  %v882_v1 = vmul.f32 %v2372_v33, %v2957_v50  ;;  %v561_v5 = vadd.f32 %v553_v17, %v495_v30  ;;  %v695_v15 = vmul.f32 %v2410_v13, %v2208_v0 }
  0x83   : > { %v682_v46 = vadd.f32 %v674_v44, %v616_v37  ;;  %v1034_v57 = vadd.f32 %v2498_v26, %v976_v48  ;;  %v430_v28 = vmul.f32 %v2949_v16, %v2194_v51  ;;  %v488_v29 = vmul.f32 %v2391_v40, %v2954_v58 }
  0x84   : > { %v889_v12 = vadd.f32 %v881_v4, %v823_v7  ;;  %v637_v55 = vadd.f32 %v629_v18, %v561_v5  ;;  %v761_v22 = vmul.f32 %v2426_v19, %v2955_v32  ;;  %v554_v33 = vmul.f32 %v2396_v60, %v2952_v31  ;;  %v1790_v5 = vld [vmem:[%s2891_s4 + $0x1] ss:$0 sm:$0xff] }
  0x85   : > { %v748_v8 = vadd.f32 %v740_v23, %v682_v46  ;;  %v1042_v35 = vmax.f32 %v1034_v57, 0.0  ;;  %v496_v62 = vadd.f32 %v488_v29, %v430_v28  ;;  %v630_v9 = vmul.f32 %v2951_v36, %v2208_v0  ;;  %v1808_v29 = vld [vmem:[%s2891_s4 + $0x2] ss:$0 sm:$0xff] }
  0x86   : > { %v955_v2 = vadd.f32 %v947_v34, %v889_v12  ;;  %v948_v51 = vmul.f32 %v2377_v24, %v2958_v43  ;;  %v703_v16 = vadd.f32 %v695_v15, %v637_v55  ;;  %v837_v40 = vmul.f32 %v2276_v59, %v2170_v63 }
  0x87   : > { %v824_v53 = vadd.f32 %v816_v11, %v748_v8  ;;  %1896 = vmatmul.mubr.msk.f32.gmra.mxu0 %vm340_vm1, %v1042_v35  ;;  %v562_v25 = vadd.f32 %v554_v33, %v496_v62  ;;  %v696_v60 = vmul.f32 %v2410_v13, %v2955_v32  ;;  %v903_v0 = vmul.f32 %v2437_v3, %v2953_v54 }
  0x88   : > { %v1013_v58 = vadd.f32 %v2457_v27, %v955_v2  ;;  %v769_v49 = vadd.f32 %v761_v22, %v703_v16  ;;  %v762_v24 = vmul.f32 %v2426_v19, %v2956_v56  ;;  %v969_v41 = vmul.f32 %v2442_v42, %v2957_v50 }
  0x89   : > { %v890_v31 = vadd.f32 %v882_v1, %v824_v53  ;;  %v638_v6 = vadd.f32 %v630_v9, %v562_v25  ;;  %v838_v13 = vmul.f32 %v2276_v59, %v2953_v54  ;;  %v904_v44 = vmul.f32 %v2437_v3, %v2957_v50  ;;  %v1772_v3 = vld [vmem:[%s2891_s4] ss:$0 sm:$0xff] }
  0x8a   : > { %v1021_v36 = vmax.f32 %v1013_v58, 0.0  ;;  %v845_v63 = vadd.f32 %v837_v40, %v769_v49  ;;  %v970_v47 = vmul.f32 %v2442_v42, %v2958_v43 }
  0x8b   : > { %v956_v52 = vadd.f32 %v948_v51, %v890_v31  ;;  %v704_v38 = vadd.f32 %v696_v60, %v638_v6 }
  0x8c   : > { %1884 = vmatprep.mubr.msk.f32.mxu1 %vm340_vm1, %v1021_v36  ;;  %v911_v20 = vadd.f32 %v903_v0, %v845_v63 }
  0x8d   : > { %v1014_v32 = vadd.f32 %v2457_v27, %v956_v52  ;;  %v770_v4 = vadd.f32 %v762_v24, %v704_v38 }
  0x8e   : > { %v977_v45 = vadd.f32 %v969_v41, %v911_v20 }
  0x8f   : > { %v1022_v19 = vmax.f32 %v1014_v32, 0.0  ;;  %v846_v21 = vadd.f32 %v838_v13, %v770_v4 }
  0x90   : > { %v1035_v14 = vadd.f32 %v2498_v26, %v977_v45 }
  0x91   : > { %1885 = vmatmul.mubr.msk.f32.gmra.mxu1 %vm340_vm1, %v1022_v19  ;;  %v912_v61 = vadd.f32 %v904_v44, %v846_v21 }
  0x92   : > { %v1043_v59 = vmax.f32 %v1035_v14, 0.0 }
  0x93   : > { %v978_v54 = vadd.f32 %v970_v47, %v912_v61 }
  0x94   : > { %1898 = vmatprep.mubr.msk.f32.mxu0 %vm340_vm1, %v1043_v59 }
  0x95   : > { %v1036_v27 = vadd.f32 %v2498_v26, %v978_v54 }
  0x97   : > { %v1044_v39 = vmax.f32 %v1036_v27, 0.0 }
  0x99   : > { %1899 = vmatmul.mubr.msk.f32.gmra.mxu0 %vm340_vm1, %v1044_v39 }
  0xf8   : > { %v1863_v42 = vpop.f32.mrf.mxu0 }
  0xf9   : > { %v1151_v26 = vadd.f32 %v1863_v42, %v1772_v3 }
  0xfa   : > { %v1145_v56 = vpop.f32.mrf.mxu0 }
  0xfb   : > { %1186 = vst.msk [vmem:[%s2744_s15 + $0x8] sm:$0xff] %vm1184_vm3, %v1151_v26  ;;  %v1869_v23 = vpop.f32.mrf.mxu1  ;;  %v1146_v17 = vadd.f32 %v1772_v3, %v1145_v56  ;;  %1203 = vrot.lane.b32.xlu0 %v1151_v26, %s1922_s25 }
  0xfc   : > { %v1171_v10 = vadd.f32 %v1869_v23, %v1772_v3 }
  0xfd   : > { %1185 = vst.msk [vmem:[%s2744_s15] sm:$0xff] %vm1184_vm3, %v1146_v17  ;;  %v1165_v37 = vpop.f32.mrf.mxu1 }
  0xfe   : > { %1190 = vst.msk [vmem:[%s2744_s15 + $0x28] sm:$0xff] %vm1184_vm3, %v1171_v10  ;;  %v1166_v30 = vadd.f32 %v1772_v3, %v1165_v37  ;;  %1211 = vrot.lane.b32.xlu1 %v1171_v10, %s1922_s25 }
  0xff   : > { %1201 = vrot.lane.b32.xlu0 %v1146_v17, %s1922_s25 }
 0x100   : > { %1189 = vst.msk [vmem:[%s2744_s15 + $0x20] sm:$0xff] %vm1184_vm3, %v1166_v30 }
 0x103   : > { %1209 = vrot.lane.b32.xlu0 %v1166_v30, %s1922_s25 }
 0x105   : > { %v1866_v18 = vpop.f32.mrf.mxu0 }
 0x106   : > { %v1161_v48 = vadd.f32 %v1866_v18, %v1772_v3 }
 0x107   : > { %v1155_v7 = vpop.f32.mrf.mxu0 }
 0x108   : > { %1188 = vst.msk [vmem:[%s2744_s15 + $0x18] sm:$0xff] %vm1184_vm3, %v1161_v48  ;;  %v1156_v50 = vadd.f32 %v1772_v3, %v1155_v7  ;;  %1207 = vrot.lane.b32.xlu1 %v1161_v48, %s1922_s25 }
 0x10a   : > { %1187 = vst.msk [vmem:[%s2744_s15 + $0x10] sm:$0xff] %vm1184_vm3, %v1156_v50 }
 0x111   : > { %v1872_v34 = vpop.f32.mrf.mxu1 }
 0x112   : > { %v1181_v11 = vadd.f32 %v1872_v34, %v1772_v3 }
 0x113   : > { %v1175_v46 = vpop.f32.mrf.mxu1 }
 0x114   : > { %1192 = vst.msk [vmem:[%s2744_s15 + $0x38] sm:$0xff] %vm1184_vm3, %v1181_v11  ;;  %v1176_v1 = vadd.f32 %v1772_v3, %v1175_v46  ;;  %1215 = vrot.lane.b32.xlu1 %v1181_v11, %s1922_s25 }
 0x116   : > { %1191 = vst.msk [vmem:[%s2744_s15 + $0x30] sm:$0xff] %vm1184_vm3, %v1176_v1  ;;  %1213 = vrot.lane.b32.xlu0 %v1176_v1, %s1922_s25 }
 0x117   : > { %v1877_v15 = vpop.f32.mrf.mxu1 }
 0x118   : > { %1205 = vrot.lane.b32.xlu1 %v1156_v50, %s1922_s25  ;;  %v1339_v57 = vadd.f32 %v1877_v15, %v1790_v5 }
 0x119   : > { %v1333_v12 = vpop.f32.mrf.mxu1 }
 0x11a   : > { %1373 = vst.msk [vmem:[%s2776_s20 + $0x8] sm:$0xff] %vm1184_vm3, %v1339_v57  ;;  %v1334_v28 = vadd.f32 %v1790_v5, %v1333_v12 }
 0x11c   : > { %1390 = vrot.lane.b32.xlu1 %v1339_v57, %s1922_s25  ;;  %1372 = vst.msk [vmem:[%s2776_s20] sm:$0xff] %vm1184_vm3, %v1334_v28  ;;  %1388 = vrot.lane.b32.xlu0 %v1334_v28, %s1922_s25 }
 0x120   : > { %v1891_v8 = vpop.f32.mrf.mxu0 }
 0x121   : > { %v1526_v55 = vadd.f32 %v1891_v8, %v1808_v29 }
 0x122   : > { %v1520_v22 = vpop.f32.mrf.mxu0 }
 0x123   : > { %1560 = vst.msk [vmem:[%s2792_s27 + $0x8] sm:$0xff] %vm1184_vm3, %v1526_v55  ;;  %v1521_v33 = vadd.f32 %v1808_v29, %v1520_v22  ;;  %1577 = vrot.lane.b32.xlu1 %v1526_v55, %s1922_s25 }
 0x125   : > { %1559 = vst.msk [vmem:[%s2792_s27] sm:$0xff] %vm1184_vm3, %v1521_v33  ;;  %1575 = vrot.lane.b32.xlu0 %v1521_v33, %s1922_s25 }
 0x12b   : > { %v1880_v35 = vpop.f32.mrf.mxu1 }
 0x12c   : > { %v1349_v2 = vadd.f32 %v1880_v35, %v1790_v5 }
 0x12d   : > { %v1343_v62 = vpop.f32.mrf.mxu1 }
 0x12e   : > { %1375 = vst.msk [vmem:[%s2776_s20 + $0x18] sm:$0xff] %vm1184_vm3, %v1349_v2  ;;  %v1344_v9 = vadd.f32 %v1790_v5, %v1343_v62  ;;  %1394 = vrot.lane.b32.xlu1 %v1349_v2, %s1922_s25 }
 0x130   : > { %1374 = vst.msk [vmem:[%s2776_s20 + $0x10] sm:$0xff] %vm1184_vm3, %v1344_v9  ;;  %1392 = vrot.lane.b32.xlu0 %v1344_v9, %s1922_s25 }
 0x134   : > { %v1894_v53 = vpop.f32.mrf.mxu0 }
 0x135   : > { %v1536_v43 = vadd.f32 %v1894_v53, %v1808_v29 }
 0x136   : > { %v1530_v51 = vpop.f32.mrf.mxu0 }
 0x137   : > { %1562 = vst.msk [vmem:[%s2792_s27 + $0x18] sm:$0xff] %vm1184_vm3, %v1536_v43  ;;  %v1531_v16 = vadd.f32 %v1808_v29, %v1530_v51  ;;  %1581 = vrot.lane.b32.xlu1 %v1536_v43, %s1922_s25 }
 0x139   : > { %1561 = vst.msk [vmem:[%s2792_s27 + $0x10] sm:$0xff] %vm1184_vm3, %v1531_v16  ;;  %1579 = vrot.lane.b32.xlu0 %v1531_v16, %s1922_s25 }
 0x13d   : > { %v1883_v40 = vpop.f32.mrf.mxu1 }
 0x13e   : > { %v1359_v58 = vadd.f32 %v1883_v40, %v1790_v5 }
 0x13f   : > { %v1353_v25 = vpop.f32.mrf.mxu1 }
 0x140   : > { %1377 = vst.msk [vmem:[%s2776_s20 + $0x28] sm:$0xff] %vm1184_vm3, %v1359_v58  ;;  %v1354_v60 = vadd.f32 %v1790_v5, %v1353_v25  ;;  %1398 = vrot.lane.b32.xlu1 %v1359_v58, %s1922_s25 }
 0x142   : > { %1376 = vst.msk [vmem:[%s2776_s20 + $0x20] sm:$0xff] %vm1184_vm3, %v1354_v60  ;;  %1396 = vrot.lane.b32.xlu0 %v1354_v60, %s1922_s25 }
 0x147   : > { %v1897_v31 = vpop.f32.mrf.mxu0 }
 0x148   : > { %v1546_v49 = vadd.f32 %v1897_v31, %v1808_v29 }
 0x149   : > { %v1540_v0 = vpop.f32.mrf.mxu0 }
 0x14a   : > { %1564 = vst.msk [vmem:[%s2792_s27 + $0x28] sm:$0xff] %vm1184_vm3, %v1546_v49  ;;  %v1541_v36 = vadd.f32 %v1808_v29, %v1540_v0  ;;  %1585 = vrot.lane.b32.xlu1 %v1546_v49, %s1922_s25 }
 0x14c   : > { %1563 = vst.msk [vmem:[%s2792_s27 + $0x20] sm:$0xff] %vm1184_vm3, %v1541_v36  ;;  %1583 = vrot.lane.b32.xlu0 %v1541_v36, %s1922_s25 }
 0x151   : > { %v1886_v6 = vpop.f32.mrf.mxu1 }
 0x152   : > { %v1369_v24 = vadd.f32 %v1886_v6, %v1790_v5 }
 0x153   : > { %v1363_v52 = vpop.f32.mrf.mxu1 }
 0x154   : > { %1379 = vst.msk [vmem:[%s2776_s20 + $0x38] sm:$0xff] %vm1184_vm3, %v1369_v24  ;;  %v1364_v63 = vadd.f32 %v1790_v5, %v1363_v52  ;;  %1402 = vrot.lane.b32.xlu1 %v1369_v24, %s1922_s25 }
 0x156   : > { %1378 = vst.msk [vmem:[%s2776_s20 + $0x30] sm:$0xff] %vm1184_vm3, %v1364_v63  ;;  %1400 = vrot.lane.b32.xlu0 %v1364_v63, %s1922_s25 }
 0x159   : > { %v1900_v41 = vpop.f32.mrf.mxu0 }
 0x15a   : > { %v1556_v38 = vadd.f32 %v1900_v41, %v1808_v29 }
 0x15b   : > { %v1550_v13 = vpop.f32.mrf.mxu0 }
 0x15c   : > { %1566 = vst.msk [vmem:[%s2792_s27 + $0x38] sm:$0xff] %vm1184_vm3, %v1556_v38  ;;  %v1551_v32 = vadd.f32 %v1808_v29, %v1550_v13  ;;  %1589 = vrot.lane.b32.xlu1 %v1556_v38, %s1922_s25 }
 0x15e   : > { %1565 = vst.msk [vmem:[%s2792_s27 + $0x30] sm:$0xff] %vm1184_vm3, %v1551_v32  ;;  %1587 = vrot.lane.b32.xlu0 %v1551_v32, %s1922_s25 }
 0x16d   : > { %v1204_v20 = vpop.permute.xlu0 %1203 }
 0x16e   : > { %1783 = vst.msk [vmem:[%s2744_s15 + $0x48] sm:$0xff] %vm1184_vm3, %v1204_v20 }
 0x170   : > { %v1212_v4 = vpop.permute.xlu1 %1211 }
 0x171   : > { %1787 = vst.msk [vmem:[%s2744_s15 + $0x68] sm:$0xff] %vm1184_vm3, %v1212_v4  ;;  %v1202_v44 = vpop.permute.xlu0 %1201 }
 0x172   : > { %1782 = vst.msk [vmem:[%s2744_s15 + $0x40] sm:$0xff] %vm1184_vm3, %v1202_v44 }
 0x175   : > { %v1210_v19 = vpop.permute.xlu0 %1209 }
 0x176   : > { %1786 = vst.msk [vmem:[%s2744_s15 + $0x60] sm:$0xff] %vm1184_vm3, %v1210_v19 }
 0x17a   : > { %v1208_v45 = vpop.permute.xlu1 %1207 }
 0x17b   : > { %1785 = vst.msk [vmem:[%s2744_s15 + $0x58] sm:$0xff] %vm1184_vm3, %v1208_v45 }
 0x186   : > { %v1216_v21 = vpop.permute.xlu1 %1215 }
 0x187   : > { %1789 = vst.msk [vmem:[%s2744_s15 + $0x78] sm:$0xff] %vm1184_vm3, %v1216_v21 }
 0x188   : > { %v1214_v47 = vpop.permute.xlu0 %1213 }
 0x189   : > { %1788 = vst.msk [vmem:[%s2744_s15 + $0x70] sm:$0xff] %vm1184_vm3, %v1214_v47 }
 0x18a   : > { %v1206_v14 = vpop.permute.xlu1 %1205 }
 0x18b   : > { %1784 = vst.msk [vmem:[%s2744_s15 + $0x50] sm:$0xff] %vm1184_vm3, %v1206_v14 }
 0x18e   : > { %v1391_v61 = vpop.permute.xlu1 %1390  ;;  %v1389_v59 = vpop.permute.xlu0 %1388 }
 0x18f   : > { %1801 = vst.msk [vmem:[%s2776_s20 + $0x48] sm:$0xff] %vm1184_vm3, %v1391_v61  ;;  %1800 = vst.msk [vmem:[%s2776_s20 + $0x40] sm:$0xff] %vm1184_vm3, %v1389_v59 }
 0x195   : > { %v1578_v54 = vpop.permute.xlu1 %1577 }
 0x196   : > { %1819 = vst.msk [vmem:[%s2792_s27 + $0x48] sm:$0xff] %vm1184_vm3, %v1578_v54 }
 0x197   : > { %v1576_v27 = vpop.permute.xlu0 %1575 }
 0x198   : > { %1818 = vst.msk [vmem:[%s2792_s27 + $0x40] sm:$0xff] %vm1184_vm3, %v1576_v27 }
 0x1a0   : > { %v1395_v39 = vpop.permute.xlu1 %1394 }
 0x1a1   : > { %1803 = vst.msk [vmem:[%s2776_s20 + $0x58] sm:$0xff] %vm1184_vm3, %v1395_v39 }
 0x1a2   : > { %v1393_v3 = vpop.permute.xlu0 %1392 }
 0x1a3   : > { %1802 = vst.msk [vmem:[%s2776_s20 + $0x50] sm:$0xff] %vm1184_vm3, %v1393_v3 }
 0x1a9   : > { %v1582_v42 = vpop.permute.xlu1 %1581 }
 0x1aa   : > { %1821 = vst.msk [vmem:[%s2792_s27 + $0x58] sm:$0xff] %vm1184_vm3, %v1582_v42 }
 0x1ab   : > { %v1580_v26 = vpop.permute.xlu0 %1579 }
 0x1ac   : > { %1820 = vst.msk [vmem:[%s2792_s27 + $0x50] sm:$0xff] %vm1184_vm3, %v1580_v26 }
 0x1b2   : > { %v1399_v56 = vpop.permute.xlu1 %1398 }
 0x1b3   : > { %1805 = vst.msk [vmem:[%s2776_s20 + $0x68] sm:$0xff] %vm1184_vm3, %v1399_v56 }
 0x1b4   : > { %v1397_v23 = vpop.permute.xlu0 %1396 }
 0x1b5   : > { %1804 = vst.msk [vmem:[%s2776_s20 + $0x60] sm:$0xff] %vm1184_vm3, %v1397_v23 }
 0x1bc   : > { %v1586_v17 = vpop.permute.xlu1 %1585 }
 0x1bd   : > { %1823 = vst.msk [vmem:[%s2792_s27 + $0x68] sm:$0xff] %vm1184_vm3, %v1586_v17 }
 0x1be   : > { %v1584_v10 = vpop.permute.xlu0 %1583 }
 0x1bf   : > { %1822 = vst.msk [vmem:[%s2792_s27 + $0x60] sm:$0xff] %vm1184_vm3, %v1584_v10 }
 0x1c6   : > { %v1403_v37 = vpop.permute.xlu1 %1402 }
 0x1c7   : > { %1807 = vst.msk [vmem:[%s2776_s20 + $0x78] sm:$0xff] %vm1184_vm3, %v1403_v37 }
 0x1c8   : > { %v1401_v30 = vpop.permute.xlu0 %1400 }
 0x1c9   : > { %1806 = vst.msk [vmem:[%s2776_s20 + $0x70] sm:$0xff] %vm1184_vm3, %v1401_v30 }
 0x1ce   : > { %v1590_v18 = vpop.permute.xlu1 %1589 }
 0x1cf   : > { %1825 = vst.msk [vmem:[%s2792_s27 + $0x78] sm:$0xff] %vm1184_vm3, %v1590_v18 }
 0x1d0   : > { %v1588_v48 = vpop.permute.xlu0 %1587 }
 0x1d1   : > { %1824 = vst.msk [vmem:[%s2792_s27 + $0x70] sm:$0xff] %vm1184_vm3, %v1588_v48 }
 0x1d2 PF: > { %s18_s24 = sadd.s32 1, %s1919_s24  }
 0x1d3   : > { %p15_p4 = scmp.ge.s32.totalorder %s18_s24, 4  }
 0x1d5   :  { %17 = sbr.rel (!%p15_p4) target bundleno = 1 (0x1), region = 98 }

</bundles_post_ra>
